<compile_context>
chip_gen: v5e
topology: v5e:2x2
jax: 0.10.0
libtpu: 0.0.40
codegen_flags: <defaults>
</compile_context>

<pallas_src>
import functools

import jax
import jax.numpy as jnp
from jax.experimental import pallas as pl
from jax.experimental.pallas import tpu as pltpu


# --------------------------------------------------------------------------- kernels

def _layernorm_f32(x, gamma, beta, eps):
    mean = jnp.mean(x, axis=-1, keepdims=True)
    var = jnp.mean(jnp.square(x - mean), axis=-1, keepdims=True)
    return (x - mean) * jax.lax.rsqrt(var + eps) * gamma + beta


def ffn_kernel_single(x_ref, gamma_ref, beta_ref, w1_ref, b1_ref, w2_ref, b2_ref,
                      o_ref, *, eps):
    """1-D grid over row tiles; W1/W2 fully resident in VMEM; no accumulator."""
    x = x_ref[...].astype(jnp.float32)                                   # (TM, inp)
    xn = _layernorm_f32(x, gamma_ref[...], beta_ref[...], eps)
    h = jnp.dot(xn.astype(jnp.bfloat16), w1_ref[...],
                preferred_element_type=jnp.float32) + b1_ref[...]        # (TM, hid)
    h = h * jax.nn.sigmoid(h)                                            # SiLU (EUP)
    # Dropout = identity (eval mode).
    out = jnp.dot(h.astype(jnp.bfloat16), w2_ref[...],
                  preferred_element_type=jnp.float32) + b2_ref[...]      # (TM, inp)
    o_ref[...] = out.astype(o_ref.dtype)
    # (second Dropout = identity in eval mode)


def ffn_kernel_reduce(x_ref, gamma_ref, beta_ref, w1_ref, b1_ref, w2_ref, b2_ref,
                      o_ref, xn_ref, acc_ref, *, eps):
    """2-D grid (row tiles x hidden tiles): W1/W2 streamed, f32 accumulator,
    LayerNorm computed once per row tile and cached as bf16 in VMEM scratch."""
    kh = pl.program_id(1)

    @pl.when(kh == 0)
    def _():
        x = x_ref[...].astype(jnp.float32)                               # (TM, inp)
        xn_ref[...] = _layernorm_f32(x, gamma_ref[...], beta_ref[...],
                                     eps).astype(jnp.bfloat16)
        acc_ref[...] = jnp.zeros_like(acc_ref)

    h = jnp.dot(xn_ref[...], w1_ref[...],
                preferred_element_type=jnp.float32) + b1_ref[...]        # (TM, TH)
    h = h * jax.nn.sigmoid(h)                                            # SiLU
    # Dropout = identity (eval mode).
    acc_ref[...] += jnp.dot(h.astype(jnp.bfloat16), w2_ref[...],
                            preferred_element_type=jnp.float32)

    @pl.when(kh == pl.num_programs(1) - 1)
    def _():
        o_ref[...] = (acc_ref[...] + b2_ref[...]).astype(o_ref.dtype)


# ----------------------------------------------------------------------- host helpers

def _round_up(a, b):
    return (a + b - 1) // b * b


def _vmem_budget_bytes():
    cap = 64 * 1024 * 1024                      # conservative fallback (v7x-sized)
    try:
        cap = int(pltpu.get_tpu_info().vmem_capacity_bytes)
    except Exception:
        pass
    # Leave ~19% headroom for compiler-internal scratch / semaphores / pipelining:
    # ~104 MiB on 128-MiB parts (v5e/v6e), ~52 MiB on v7x.
    return (cap * 13) // 16


def _default_tile_m():
    kind = ""
    try:
        kind = jax.devices()[0].device_kind.lower()
    except Exception:
        pass
    # v5e-class: 4x128^2 MXU, roofline knee ~240 flop/byte -> 128 rows is enough.
    if any(t in kind for t in ("v2", "v3", "v4", "v5 lite", "v5e", "v5lite")):
        return 128
    # v6e / v7x: 256-wide MXU, knee ~620-655 flop/byte -> larger row tiles so streamed
    # weights are reused enough to keep the MXU fed.
    return 512


def _est_single_bytes(tm, inp, hid_pad):
    """Rough VMEM footprint of the single-pass (weights fully resident) kernel."""
    return (4 * tm * inp * 4                    # x / out streams (double-buffered)
            + 4 * inp * hid_pad * 2             # W1 + W2 (bf16, x2 pipeline buffers)
            + 2 * hid_pad * 4 + 8 * inp * 4     # b1, gamma, beta, b2
            + tm * hid_pad * 6                  # live hidden activation (f32 + bf16)
            + tm * inp * 12)                    # xn / result temporaries


def _est_reduce_bytes(tm, th, inp):
    """Rough VMEM footprint of the hidden-dim streaming kernel."""
    return (4 * tm * inp * 4                    # x / out streams
            + 4 * inp * th * 2                  # W1 + W2 slices (bf16, double-buffered)
            + 2 * th * 4 + 8 * inp * 4          # b1 slice, gamma, beta, b2
            + tm * th * 6                       # live hidden slice (f32 + bf16)
            + tm * inp * 6                      # xn (bf16) + acc (f32) scratch
            + tm * inp * 8)                     # temporaries


def prepare_ffn_params(params):
    """One-time parameter preprocessing (hoisted out of the forward pass):
    bf16 weight casts, 2-D views of per-feature vectors and zero-padding of the
    hidden dim to a multiple of 128 so it tiles with lane-aligned blocks."""
    gamma, beta, w1, b1, w2, b2 = params
    inp, hid = w1.shape
    hid_pad = _round_up(hid, 128)
    ph = hid_pad - hid
    return dict(
        inp=inp, hid=hid, hid_pad=hid_pad,
        gamma=gamma.reshape(1, inp).astype(jnp.float32),
        beta=beta.reshape(1, inp).astype(jnp.float32),
        w1=jnp.pad(w1, ((0, 0), (0, ph))).astype(jnp.bfloat16),
        b1=jnp.pad(b1, (0, ph)).reshape(1, hid_pad).astype(jnp.float32),
        w2=jnp.pad(w2, ((0, ph), (0, 0))).astype(jnp.bfloat16),
        b2=b2.reshape(1, inp).astype(jnp.float32),
    )


def ffn_forward(x, params, *, tile_m=None, tile_h=None, eps=1e-5):
    """x: (..., inp) float. `params`: prepare_ffn_params(...) dict (preferred, hoists
    the bf16 casts out of the call) or the raw (gamma, beta, w1, b1, w2, b2) tuple.
    Returns an array with x's shape/dtype."""
    prep = params if isinstance(params, dict) else prepare_ffn_params(params)
    inp, hid_pad = prep["inp"], prep["hid_pad"]
    assert x.shape[-1] == inp

    orig_shape = x.shape
    x2d = x.reshape(-1, inp)
    m = x2d.shape[0]

    # ---- row tile (per-generation default, clamped for tiny inputs) ----
    tm = tile_m if tile_m is not None else _default_tile_m()
    tm = _round_up(max(8, min(tm, _round_up(m, 8))), 8)

    budget = _vmem_budget_bytes()

    # ---- path / hidden-tile selection ----
    if tile_h is not None:
        th = min(_round_up(max(tile_h, 128), 128), hid_pad)
        while hid_pad % th:
            th -= 128
    elif _est_single_bytes(tm, inp, hid_pad) <= budget:
        th = hid_pad                              # weights fit: collapse reduction axis
    else:
        th = 128
        for cand in range(hid_pad, 127, -128):    # largest lane-aligned tile that fits
            if hid_pad % cand == 0 and _est_reduce_bytes(tm, cand, inp) <= budget:
                th = cand
                break
        while _est_reduce_bytes(tm, th, inp) > budget and tm > 8:
            tm = max(8, _round_up(tm // 2, 8))    # last resort: shrink the row tile
    single = th == hid_pad

    m_pad = _round_up(m, tm)
    if m_pad != m:
        x2d = jnp.pad(x2d, ((0, m_pad - m), (0, 0)))

    args = (x2d, prep["gamma"], prep["beta"], prep["w1"], prep["b1"],
            prep["w2"], prep["b2"])

    if single:
        grid = (m_pad // tm,)
        in_specs = [
            pl.BlockSpec((tm, inp), lambda i: (i, 0)),        # x tile
            pl.BlockSpec((1, inp), lambda i: (0, 0)),         # gamma
            pl.BlockSpec((1, inp), lambda i: (0, 0)),         # beta
            pl.BlockSpec((inp, hid_pad), lambda i: (0, 0)),   # W1 (resident)
            pl.BlockSpec((1, hid_pad), lambda i: (0, 0)),     # b1
            pl.BlockSpec((hid_pad, inp), lambda i: (0, 0)),   # W2 (resident)
            pl.BlockSpec((1, inp), lambda i: (0, 0)),         # b2
        ]
        out_specs = pl.BlockSpec((tm, inp), lambda i: (i, 0))
        scratch = []
        kernel = functools.partial(ffn_kernel_single, eps=eps)
        dims = ("parallel",)
    else:
        grid = (m_pad // tm, hid_pad // th)
        in_specs = [
            pl.BlockSpec((tm, inp), lambda i, kh: (i, 0)),    # x tile (reused over kh)
            pl.BlockSpec((1, inp), lambda i, kh: (0, 0)),     # gamma
            pl.BlockSpec((1, inp), lambda i, kh: (0, 0)),     # beta
            pl.BlockSpec((inp, th), lambda i, kh: (0, kh)),   # W1 slice (streamed)
            pl.BlockSpec((1, th), lambda i, kh: (0, kh)),     # b1 slice
            pl.BlockSpec((th, inp), lambda i, kh: (kh, 0)),   # W2 slice (streamed)
            pl.BlockSpec((1, inp), lambda i, kh: (0, 0)),     # b2
        ]
        out_specs = pl.BlockSpec((tm, inp), lambda i, kh: (i, 0))
        scratch = [pltpu.VMEM((tm, inp), jnp.bfloat16),       # cached LayerNorm output
                   pltpu.VMEM((tm, inp), jnp.float32)]        # f32 accumulator
        kernel = functools.partial(ffn_kernel_reduce, eps=eps)
        dims = ("parallel", "arbitrary")

    out = pl.pallas_call(
        kernel,
        out_shape=jax.ShapeDtypeStruct((m_pad, inp), x.dtype),
        grid_spec=pltpu.PrefetchScalarGridSpec(
            num_scalar_prefetch=0,
            grid=grid,
            in_specs=in_specs,
            out_specs=out_specs,
            scratch_shapes=scratch),
        compiler_params=pltpu.CompilerParams(
            dimension_semantics=dims,
            vmem_limit_bytes=int(budget)),
    )(*args)

    return out[:m].reshape(orig_shape)


# ------------------------------------------------------------------- reference / init

def init_ffn_params(key, inp=64):
    """Deterministic synthetic parameters matching FFN(inp) shapes (PyTorch init)."""
    hid = inp * 4
    k1, k2, k3, k4 = jax.random.split(key, 4)
    gamma = jnp.ones((inp,), jnp.float32)                 # LayerNorm defaults
    beta = jnp.zeros((inp,), jnp.float32)
    lim1 = 1.0 / (inp ** 0.5)
    w1 = jax.random.uniform(k1, (inp, hid), jnp.float32, -lim1, lim1)
    b1 = jax.random.uniform(k2, (hid,), jnp.float32, -lim1, lim1)
    lim2 = 1.0 / (hid ** 0.5)
    w2 = jax.random.uniform(k3, (hid, inp), jnp.float32, -lim2, lim2)
    b2 = jax.random.uniform(k4, (inp,), jnp.float32, -lim2, lim2)
    return (gamma, beta, w1, b1, w2, b2)


def ffn_reference(x, params, eps=1e-5):
    """Pure-JAX f32 reference of the PyTorch forward (eval mode)."""
    gamma, beta, w1, b1, w2, b2 = params
    mean = jnp.mean(x, axis=-1, keepdims=True)
    var = jnp.mean((x - mean) ** 2, axis=-1, keepdims=True)
    xn = (x - mean) / jnp.sqrt(var + eps) * gamma + beta
    h = xn @ w1 + b1
    h = h * jax.nn.sigmoid(h)
    return h @ w2 + b2


# --------------------------------------------------------------------------- __main__

if __name__ == "__main__":
    inp = 64            # FFN default feature size (hidden = 256)
    batch, seq = 2, 72  # M = 144 rows: exercises row clamping/padding

    key = jax.random.PRNGKey(0)
    kx, kp = jax.random.split(key)
    x = jax.random.normal(kx, (batch, seq, inp), jnp.float32)
    params = init_ffn_params(kp, inp=inp)
    prep = prepare_ffn_params(params)       # one-time bf16 cast / padding / 2-D views

    y_ref = ffn_reference(x, params)

    # Auto config: weights fit VMEM -> single-pass 1-D grid, no accumulator / kh loop.
    y = jax.block_until_ready(ffn_forward(x, prep))
    assert y.shape == x.shape
    # bf16 matmul operands with f32 accumulation -> loosened tolerance vs f32 ref.
    assert jnp.allclose(y, y_ref, atol=5e-2, rtol=5e-2), "single-pass mismatch"

    # Streaming path: force hidden-dim tiling (tile_h=128 -> 2 reduction steps) to
    # exercise the cached-LayerNorm + accumulator kernel as well.
    y2 = jax.block_until_ready(ffn_forward(x, prep, tile_h=128))
    assert y2.shape == x.shape
    assert jnp.allclose(y2, y_ref, atol=5e-2, rtol=5e-2), "streaming-path mismatch"

    print("KERNEL_OK")
</pallas_src>

<mosaic_0001>
module attributes {stable_mosaic.version = 11 : i64} {
  func.func @ffn_kernel_single(%arg0: i32, %arg1: memref<144x64xf32, #tpu.memory_space<vmem>>, %arg2: memref<1x64xf32, #tpu.memory_space<vmem>>, %arg3: memref<1x64xf32, #tpu.memory_space<vmem>>, %arg4: memref<64x256xbf16, #tpu.memory_space<vmem>>, %arg5: memref<1x256xf32, #tpu.memory_space<vmem>>, %arg6: memref<256x64xbf16, #tpu.memory_space<vmem>>, %arg7: memref<1x64xf32, #tpu.memory_space<vmem>>, %arg8: memref<144x64xf32, #tpu.memory_space<vmem>>) attributes {dimension_semantics = [#tpu.dimension_semantics<parallel>], iteration_bounds = array<i64: 1>, scalar_prefetch = 0 : i64, scratch_operands = 0 : i64, tpu.core_type = #tpu.core_type<tc>, window_params = [{transform_indices = @transform_0, window_bounds = array<i64: 144, 64>}, {pipeline_mode = #tpu.pipeline_mode<synchronous>, transform_indices = @transform_1, window_bounds = array<i64: 1, 64>}, {pipeline_mode = #tpu.pipeline_mode<synchronous>, transform_indices = @transform_2, window_bounds = array<i64: 1, 64>}, {pipeline_mode = #tpu.pipeline_mode<synchronous>, transform_indices = @transform_3, window_bounds = array<i64: 64, 256>}, {pipeline_mode = #tpu.pipeline_mode<synchronous>, transform_indices = @transform_4, window_bounds = array<i64: 1, 256>}, {pipeline_mode = #tpu.pipeline_mode<synchronous>, transform_indices = @transform_5, window_bounds = array<i64: 256, 64>}, {pipeline_mode = #tpu.pipeline_mode<synchronous>, transform_indices = @transform_6, window_bounds = array<i64: 1, 64>}, {transform_indices = @transform_7, window_bounds = array<i64: 144, 64>}]} {
    %c0 = arith.constant 0 : index
    %c0_0 = arith.constant 0 : index
    %0 = vector.load %arg1[%c0, %c0_0] : memref<144x64xf32, #tpu.memory_space<vmem>>, vector<144x64xf32>
    %c0_1 = arith.constant 0 : index
    %c0_2 = arith.constant 0 : index
    %1 = vector.load %arg2[%c0_1, %c0_2] : memref<1x64xf32, #tpu.memory_space<vmem>>, vector<1x64xf32>
    %c0_3 = arith.constant 0 : index
    %c0_4 = arith.constant 0 : index
    %2 = vector.load %arg3[%c0_3, %c0_4] : memref<1x64xf32, #tpu.memory_space<vmem>>, vector<1x64xf32>
    %cst = arith.constant dense<0.000000e+00> : vector<144xf32>
    %3 = vector.multi_reduction <add>, %0, %cst [1] : vector<144x64xf32> to vector<144xf32>
    %4 = vector.shape_cast %3 : vector<144xf32> to vector<144x1xf32>
    %cst_5 = arith.constant 6.400000e+01 : f32
    %5 = vector.broadcast %cst_5 : f32 to vector<144x1xf32>
    %6 = arith.divf %4, %5 : vector<144x1xf32>
    %7 = vector.broadcast %6 : vector<144x1xf32> to vector<144x64xf32>
    %8 = arith.subf %0, %7 : vector<144x64xf32>
    %9 = arith.mulf %8, %8 : vector<144x64xf32>
    %cst_6 = arith.constant dense<0.000000e+00> : vector<144xf32>
    %10 = vector.multi_reduction <add>, %9, %cst_6 [1] : vector<144x64xf32> to vector<144xf32>
    %11 = vector.shape_cast %10 : vector<144xf32> to vector<144x1xf32>
    %cst_7 = arith.constant 6.400000e+01 : f32
    %12 = vector.broadcast %cst_7 : f32 to vector<144x1xf32>
    %13 = arith.divf %11, %12 : vector<144x1xf32>
    %14 = vector.broadcast %6 : vector<144x1xf32> to vector<144x64xf32>
    %15 = arith.subf %0, %14 : vector<144x64xf32>
    %cst_8 = arith.constant 9.99999974E-6 : f32
    %16 = vector.broadcast %cst_8 : f32 to vector<144x1xf32>
    %17 = arith.addf %13, %16 : vector<144x1xf32>
    %18 = math.rsqrt %17 : vector<144x1xf32>
    %19 = vector.broadcast %18 : vector<144x1xf32> to vector<144x64xf32>
    %20 = arith.mulf %15, %19 : vector<144x64xf32>
    %21 = vector.broadcast %1 : vector<1x64xf32> to vector<144x64xf32>
    %22 = arith.mulf %20, %21 : vector<144x64xf32>
    %23 = vector.broadcast %2 : vector<1x64xf32> to vector<144x64xf32>
    %24 = arith.addf %22, %23 : vector<144x64xf32>
    %25 = arith.truncf %24 : vector<144x64xf32> to vector<144x64xbf16>
    %c0_9 = arith.constant 0 : index
    %c0_10 = arith.constant 0 : index
    %26 = vector.load %arg4[%c0_9, %c0_10] : memref<64x256xbf16, #tpu.memory_space<vmem>>, vector<64x256xbf16>
    %cst_11 = arith.constant dense<0.000000e+00> : vector<144x256xf32>
    %27 = tpu.matmul %25, %26, %cst_11 {dimension_numbers = #tpu.dot_dimension_numbers<[1], [0], [0], [1], [0, 0, 1, 1], [], []>} : vector<144x64xbf16>, vector<64x256xbf16>, vector<144x256xf32> -> vector<144x256xf32>
    %c0_12 = arith.constant 0 : index
    %c0_13 = arith.constant 0 : index
    %28 = vector.load %arg5[%c0_12, %c0_13] : memref<1x256xf32, #tpu.memory_space<vmem>>, vector<1x256xf32>
    %29 = vector.broadcast %28 : vector<1x256xf32> to vector<144x256xf32>
    %30 = arith.addf %27, %29 : vector<144x256xf32>
    %31 = arith.negf %30 : vector<144x256xf32>
    %32 = math.exp %31 : vector<144x256xf32>
    %cst_14 = arith.constant 1.000000e+00 : f32
    %33 = vector.broadcast %cst_14 : f32 to vector<144x256xf32>
    %34 = arith.addf %33, %32 : vector<144x256xf32>
    %35 = arith.divf %33, %34 : vector<144x256xf32>
    %36 = arith.mulf %30, %35 : vector<144x256xf32>
    %37 = arith.truncf %36 : vector<144x256xf32> to vector<144x256xbf16>
    %c0_15 = arith.constant 0 : index
    %c0_16 = arith.constant 0 : index
    %38 = vector.load %arg6[%c0_15, %c0_16] : memref<256x64xbf16, #tpu.memory_space<vmem>>, vector<256x64xbf16>
    %cst_17 = arith.constant dense<0.000000e+00> : vector<144x64xf32>
    %39 = tpu.matmul %37, %38, %cst_17 {dimension_numbers = #tpu.dot_dimension_numbers<[1], [0], [0], [1], [0, 0, 1, 1], [], []>} : vector<144x256xbf16>, vector<256x64xbf16>, vector<144x64xf32> -> vector<144x64xf32>
    %c0_18 = arith.constant 0 : index
    %c0_19 = arith.constant 0 : index
    %40 = vector.load %arg7[%c0_18, %c0_19] : memref<1x64xf32, #tpu.memory_space<vmem>>, vector<1x64xf32>
    %41 = vector.broadcast %40 : vector<1x64xf32> to vector<144x64xf32>
    %42 = arith.addf %39, %41 : vector<144x64xf32>
    %c0_20 = arith.constant 0 : index
    %c0_21 = arith.constant 0 : index
    %43 = vector.load %arg8[%c0_20, %c0_21] : memref<144x64xf32, #tpu.memory_space<vmem>>, vector<144x64xf32>
    tpu.vector_store %arg8[%c0_20, %c0_21], %42 {strides = array<i32>} : memref<144x64xf32, #tpu.memory_space<vmem>>, vector<144x64xf32>,
    return
  }
  func.func @transform_0(%arg0: i32) -> (i32, i32) {
    %c0_i32 = arith.constant 0 : i32
    %c0_i32_0 = arith.constant 0 : i32
    return %arg0, %c0_i32 : i32, i32
  }
  func.func @transform_1(%arg0: i32) -> (i32, i32) {
    %c0_i32 = arith.constant 0 : i32
    %c0_i32_0 = arith.constant 0 : i32
    %c0_i32_1 = arith.constant 0 : i32
    return %c0_i32, %c0_i32_0 : i32, i32
  }
  func.func @transform_2(%arg0: i32) -> (i32, i32) {
    %c0_i32 = arith.constant 0 : i32
    %c0_i32_0 = arith.constant 0 : i32
    %c0_i32_1 = arith.constant 0 : i32
    return %c0_i32, %c0_i32_0 : i32, i32
  }
  func.func @transform_3(%arg0: i32) -> (i32, i32) {
    %c0_i32 = arith.constant 0 : i32
    %c0_i32_0 = arith.constant 0 : i32
    %c0_i32_1 = arith.constant 0 : i32
    return %c0_i32, %c0_i32_0 : i32, i32
  }
  func.func @transform_4(%arg0: i32) -> (i32, i32) {
    %c0_i32 = arith.constant 0 : i32
    %c0_i32_0 = arith.constant 0 : i32
    %c0_i32_1 = arith.constant 0 : i32
    return %c0_i32, %c0_i32_0 : i32, i32
  }
  func.func @transform_5(%arg0: i32) -> (i32, i32) {
    %c0_i32 = arith.constant 0 : i32
    %c0_i32_0 = arith.constant 0 : i32
    %c0_i32_1 = arith.constant 0 : i32
    return %c0_i32, %c0_i32_0 : i32, i32
  }
  func.func @transform_6(%arg0: i32) -> (i32, i32) {
    %c0_i32 = arith.constant 0 : i32
    %c0_i32_0 = arith.constant 0 : i32
    %c0_i32_1 = arith.constant 0 : i32
    return %c0_i32, %c0_i32_0 : i32, i32
  }
  func.func @transform_7(%arg0: i32) -> (i32, i32) {
    %c0_i32 = arith.constant 0 : i32
    %c0_i32_0 = arith.constant 0 : i32
    return %arg0, %c0_i32 : i32, i32
  }
}

</mosaic_0001>

<bundles_post_ra>
// kernel: tpu_custom_call.1
= control target key start
LH: loop header
LB: loop body
LE: loop exit
PB: predicated region body
PF: predicated region fallthrough
CT: control target
= control target key end

     0   :  { %vm47_vm0 = vcmask 523264   ;;  %v2053_v14 = vmov 64.0   ;;  %s3629_s0 = inlined_call_operand.vmem [shape: f32[144,64], index: 0, kind: input, shape index: {}]   ;;  %s3630_s1 = inlined_call_operand.vmem [shape: f32[1,64], index: 1, kind: input, shape index: {}]   ;;  %s3631_s2 = inlined_call_operand.vmem [shape: f32[1,64], index: 2, kind: input, shape index: {}]   ;;  %s3632_s3 = inlined_call_operand.vmem [shape: bf16[64,256], index: 3, kind: input, shape index: {}]   ;;  %s3633_s5 = inlined_call_operand.vmem [shape: bf16[256,64], index: 5, kind: input, shape index: {}]   ;;  %s3634_s4 = inlined_call_operand.vmem [shape: f32[1,256], index: 4, kind: input, shape index: {}]   ;;  %s3635_s6 = inlined_call_operand.vmem [shape: f32[1,64], index: 6, kind: input, shape index: {}]   ;;  %s3636_s7 = inlined_call_operand.vmem [shape: f32[144,64], index: 7, kind: output, shape index: {}]  }
   0x1   :  { %v29_v0 = vld [vmem:[%s3629_s0 + $0x10] sm:$0xff]  ;;  %v27_v1 = vld [vmem:[%s3629_s0] sm:$0xff]  ;;  %v30_v6 = vld [vmem:[%s3629_s0 + $0x18] sm:$0xff]  ;;  %1869 = vrcp.f32 %v2053_v14 }
   0x2   :  { %v54_v2 = vsel %vm47_vm0, %v29_v0, 0.0  ;;  %v48_v3 = vsel %vm47_vm0, %v27_v1, 0.0  ;;  %v31_v4 = vld [vmem:[%s3629_s0 + $0x20] sm:$0xff]  ;;  %v28_v7 = vld [vmem:[%s3629_s0 + $0x8] sm:$0xff]  ;;  %v57_v9 = vsel %vm47_vm0, %v30_v6, 0.0  ;;  %v33_v12 = vld [vmem:[%s3629_s0 + $0x30] sm:$0xff] }
   0x3   :  { %55 = vadd.xlane.f32.xlu1 %v54_v2  ;;  %49 = vadd.xlane.f32.xlu0 %v48_v3  ;;  %v60_v5 = vsel %vm47_vm0, %v31_v4, 0.0  ;;  %v32_v8 = vld [vmem:[%s3629_s0 + $0x28] sm:$0xff]  ;;  %v51_v10 = vsel %vm47_vm0, %v28_v7, 0.0  ;;  %v66_v13 = vsel %vm47_vm0, %v33_v12, 0.0  ;;  %v2137_v34 = vld [vmem:[%s3629_s0 + $0x38] sm:$0xff]  ;;  %v2161_v47 = vld [vmem:[%s3629_s0 + $0x40] sm:$0xff] }
   0x4   :  { %61 = vadd.xlane.f32.xlu2 %v60_v5  ;;  %v63_v11 = vsel %vm47_vm0, %v32_v8, 0.0  ;;  %v69_v40 = vsel %vm47_vm0, %v2137_v34, 0.0  ;;  %v72_v51 = vsel %vm47_vm0, %v2161_v47, 0.0  ;;  %v2177_v56 = vld [vmem:[%s3629_s0 + $0x58] sm:$0xff]  ;;  %v2182_v57 = vld [vmem:[%s3629_s0 + $0x48] sm:$0xff]  ;;  %v2196_v63 = vld [vmem:[%s3629_s0 + $0x60] sm:$0xff] }
   0x5   :  { %v81_v59 = vsel %vm47_vm0, %v2177_v56, 0.0  ;;  %v75_v61 = vsel %vm47_vm0, %v2182_v57, 0.0  ;;  %v1709_v14 = vld [vmem:[%s3632_s3 + $0x20] sm:$0xf] }
   0x7   :  { %v1870_v15 = vpop.eup %1869 }
   0x8   :  { %v103_v16 = vmul.f32 64.0, %v1870_v15  ;;  %vm107_vm1 = vweird.f32 %v1870_v15 }
   0xa   :  { %v104_v17 = vsub.f32 1.0, %v103_v16  ;;  %v1845_v16 = vld [vmem:[%s3632_s3 + $0x24] sm:$0xf] }
   0xb   :  { %58 = vadd.xlane.f32.xlu1 %v57_v9  ;;  %52 = vadd.xlane.f32.xlu0 %v51_v10  ;;  %v1848_v9 = vld [vmem:[%s3632_s3 + $0x34] sm:$0xf0]  ;;  %v1847_v10 = vld [vmem:[%s3632_s3 + $0x34] sm:$0xf] }
   0xc   :  { %64 = vadd.xlane.f32.xlu2 %v63_v11  ;;  %v105_v18 = vmul.f32 %v1870_v15, %v104_v17 }
   0xe   :  { %v106_v19 = vadd.f32 %v1870_v15, %v105_v18  ;;  %v1711_v18 = vld [vmem:[%s3632_s3 + $0x28] sm:$0xf0] }
  0x10   :  { %v2122_v20 = vsel %vm107_vm1, %v1870_v15, %v106_v19  ;;  %v1846_v15 = vld [vmem:[%s3632_s3 + $0x24] sm:$0xf0]  ;;  %v1714_v19 = vor.u32 %v1845_v16, %v1711_v18 }
  0x11   :  { %v1710_v17 = vor.u32 %v1846_v15, %v1709_v14 }
  0x14   :  { %67 = vadd.xlane.f32.xlu2 %v66_v13 }
  0x76   :  { %v56_v21 = vpop.xlane.xlu1 %55  ;;  %v50_v22 = vpop.xlane.xlu0 %49 }
  0x77   :  { %v109_v23 = vmul.f32 %v2122_v20, %v50_v22  ;;  %v62_v24 = vpop.xlane.xlu2 %61  ;;  %v111_v33 = vmul.f32 %v2122_v20, %v56_v21  ;;  %v1701_v21 = vld [vmem:[%s3632_s3 + $0x10] sm:$0xf]  ;;  %v1844_v22 = vld [vmem:[%s3632_s3 + $0x14] sm:$0xf0] }
  0x78   :  { %v113_v32 = vmul.f32 %v2122_v20, %v62_v24 }
  0x79   :  { %v2125_v25 = vsub.f32 %v27_v1, %v109_v23  ;;  %v2151_v42 = vsub.f32 %v29_v0, %v111_v33  ;;  %v2201_v0 = vld [vmem:[%s3629_s0 + $0x50] sm:$0xff]  ;;  %v84_v1 = vsel %vm47_vm0, %v2196_v63, 0.0 }
  0x7a   :  { %v2143_v38 = vsub.f32 %v31_v4, %v113_v32  ;;  %v78_v3 = vsel %vm47_vm0, %v2201_v0, 0.0  ;;  %v2211_v4 = vld [vmem:[%s3629_s0 + $0x68] sm:$0xff]  ;;  %v1843_v23 = vld [vmem:[%s3632_s3 + $0x14] sm:$0xf] }
  0x7b   :  { %v145_v26 = vmul.f32 %v2125_v25, %v2125_v25  ;;  %v147_v48 = vmul.f32 %v2151_v42, %v2151_v42  ;;  %v87_v5 = vsel %vm47_vm0, %v2211_v4, 0.0  ;;  %v1842_v32 = vld [vmem:[%s3632_s3 + $0x4] sm:$0xf0] }
  0x7c   :  { %v149_v46 = vmul.f32 %v2143_v38, %v2143_v38 }
  0x7d   :  { %v163_v27 = vsel %vm47_vm0, %v145_v26, 0.0  ;;  %v169_v52 = vsel %vm47_vm0, %v147_v48, 0.0  ;;  %v1702_v26 = vor.u32 %v1844_v22, %v1701_v21 }
  0x7e   :  { %v59_v28 = vpop.xlane.xlu1 %58  ;;  %164 = vadd.xlane.f32.xlu0 %v163_v27  ;;  %v53_v29 = vpop.xlane.xlu0 %52  ;;  %v175_v50 = vsel %vm47_vm0, %v149_v46, 0.0  ;;  %v1703_v27 = vld [vmem:[%s3632_s3 + $0x18] sm:$0xf0] }
  0x7f   :  { %v112_v30 = vmul.f32 %v2122_v20, %v59_v28  ;;  %v110_v31 = vmul.f32 %v2122_v20, %v53_v29  ;;  %v65_v37 = vpop.xlane.xlu2 %64  ;;  %v1706_v29 = vor.u32 %v1843_v23, %v1703_v27 }
  0x80   :  { %v114_v45 = vmul.f32 %v2122_v20, %v65_v37  ;;  %v1841_v37 = vld [vmem:[%s3632_s3 + $0x4] sm:$0xf] }
  0x81   :  { %v2139_v35 = vsub.f32 %v30_v6, %v112_v30  ;;  %v2141_v36 = vsub.f32 %v28_v7, %v110_v31  ;;  %v2218_v6 = vld [vmem:[%s3629_s0 + $0x70] sm:$0xff]  ;;  %v1693_v31 = vld [vmem:[%s3632_s3] sm:$0xf] }
  0x82   :  { %v2165_v49 = vsub.f32 %v32_v8, %v114_v45  ;;  %v90_v7 = vsel %vm47_vm0, %v2218_v6, 0.0  ;;  %v1717_v8 = vld [vmem:[%s3632_s3 + $0x30] sm:$0xf]  ;;  %v1694_v33 = vor.u32 %v1842_v32, %v1693_v31 }
  0x83   :  { %v148_v39 = vmul.f32 %v2139_v35, %v2139_v35  ;;  %v146_v41 = vmul.f32 %v2141_v36, %v2141_v36  ;;  %v1718_v11 = vor.u32 %v1848_v9, %v1717_v8 }
  0x84   :  { %v150_v55 = vmul.f32 %v2165_v49, %v2165_v49 }
  0x85   :  { %v172_v43 = vsel %vm47_vm0, %v148_v39, 0.0  ;;  %v166_v44 = vsel %vm47_vm0, %v146_v41, 0.0  ;;  %587 = vmatpush.bf16.msra.mxu0 %v1718_v11  ;;  %v1695_v39 = vld [vmem:[%s3632_s3 + $0x8] sm:$0xf0] }
  0x86   :  { %173 = vadd.xlane.f32.xlu2 %v172_v43  ;;  %70 = vadd.xlane.f32.xlu0 %v69_v40  ;;  %v178_v60 = vsel %vm47_vm0, %v150_v55, 0.0  ;;  %v1698_v40 = vor.u32 %v1841_v37, %v1695_v39  ;;  %v2325_v39 = vld [vmem:[%s3629_s0 + $0x78] sm:$0xff] }
  0x87   :  { %167 = vadd.xlane.f32.xlu1 %v166_v44  ;;  %v68_v53 = vpop.xlane.xlu2 %67 }
  0x88   :  { %v115_v54 = vmul.f32 %v2122_v20, %v68_v53 }
  0x89   :  { %588 = vmatpush.bf16.msra.mxu0 %v1710_v17 }
  0x8a   :  { %v2184_v58 = vsub.f32 %v33_v12, %v115_v54  ;;  %v1719_v12 = vld [vmem:[%s3632_s3 + $0x38] sm:$0xf0] }
  0x8b   :  { %v1722_v13 = vor.u32 %v1847_v10, %v1719_v12 }
  0x8c   :  { %v151_v62 = vmul.f32 %v2184_v58, %v2184_v58 }
  0x8d   :  { %641 = vmatpush.bf16.msra.mxu1 %v1722_v13  ;;  %589 = vmatpush.bf16.msra.mxu0 %v1702_v26 }
  0x8e   :  { %176 = vadd.xlane.f32.xlu2 %v175_v50  ;;  %73 = vadd.xlane.f32.xlu0 %v72_v51  ;;  %v181_v2 = vsel %vm47_vm0, %v151_v62, 0.0 }
  0x8f   :  { %170 = vadd.xlane.f32.xlu1 %v169_v52 }
  0x91   :  { %642 = vmatpush.bf16.msra.mxu1 %v1714_v19  ;;  %590 = vmatpush.bf16.msra.mxu0 %v1694_v33 }
  0x95   :  { %643 = vmatpush.bf16.msra.mxu1 %v1706_v29 }
  0x96   :  { %82 = vadd.xlane.f32.xlu2 %v81_v59  ;;  %179 = vadd.xlane.f32.xlu0 %v178_v60 }
  0x97   :  { %76 = vadd.xlane.f32.xlu1 %v75_v61 }
  0x99   :  { %644 = vmatpush.bf16.msra.mxu1 %v1698_v40 }
  0x9e   :  { %85 = vadd.xlane.f32.xlu2 %v84_v1  ;;  %182 = vadd.xlane.f32.xlu0 %v181_v2 }
  0x9f   :  { %79 = vadd.xlane.f32.xlu1 %v78_v3 }
  0xa6   :  { %88 = vadd.xlane.f32.xlu0 %v87_v5 }
  0xae   :  { %91 = vadd.xlane.f32.xlu0 %v90_v7 }
  0xf1   :  { %v165_v24 = vpop.xlane.xlu0 %164 }
  0xf2   :  { %v217_v28 = vmul.f32 %v165_v24, %v2122_v20 }
  0xf4   :  { %v235_v30 = vadd.f32 1e-05, %v217_v28 }
  0xf6   :  { %1871 = vrsqrt.f32 %v235_v30  ;;  %vm259_vm3 = vweird.f32 %v235_v30 }
  0xf9   :  { %v174_v41 = vpop.xlane.xlu2 %173  ;;  %v71_v43 = vpop.xlane.xlu0 %70 }
  0xfa   :  { %v220_v44 = vmul.f32 %v174_v41, %v2122_v20  ;;  %v168_v45 = vpop.xlane.xlu1 %167  ;;  %v116_v46 = vmul.f32 %v2122_v20, %v71_v43  ;;  %v2334_v43 = vld [vmem:[%s3630_s1] ss:$0 sm:$0xff] }
  0xfb   :  { %v218_v48 = vmul.f32 %v168_v45, %v2122_v20 }
  0xfc   :  { %v1872_v50 = vpop.eup %1871  ;;  %v2274_v51 = vadd.f32 1e-05, %v220_v44  ;;  %v2277_v52 = vsub.f32 %v2137_v34, %v116_v46 }
  0xfd   :  { %v254_v53 = vmul.f32 %v1872_v50, %v235_v30  ;;  %v236_v54 = vadd.f32 1e-05, %v218_v48  ;;  %vm260_vm2 = vweird.f32 %v1872_v50  ;;  %v93_v48 = vsel %vm47_vm0, %v2325_v39, 0.0 }
  0xfe   :  { %1873 = vrsqrt.f32 %v2274_v51  ;;  %v152_v55 = vmul.f32 %v2277_v52, %v2277_v52  ;;  %vm2300_vm4 = vmor %vm259_vm3, %vm260_vm2  ;;  %vm289_vm8 = vweird.f32 %v2274_v51 }
  0xff   :  { %v255_v59 = vmul.f32 %v1872_v50, %v254_v53  ;;  %1875 = vrsqrt.f32 %v236_v54  ;;  %vm269_vm6 = vweird.f32 %v236_v54 }
 0x100   :  { %v184_v60 = vsel %vm47_vm0, %v152_v55, 0.0 }
 0x101   :  { %v256_v61 = vmul.f32 0.5, %v255_v59  ;;  %v177_v62 = vpop.xlane.xlu2 %176  ;;  %185 = vadd.xlane.f32.xlu1 %v184_v60  ;;  %v74_v1 = vpop.xlane.xlu0 %73 }
 0x102   :  { %v171_v2 = vpop.xlane.xlu1 %170  ;;  %v117_v3 = vmul.f32 %v2122_v20, %v74_v1  ;;  %v221_v10 = vmul.f32 %v177_v62, %v2122_v20 }
 0x103   :  { %v257_v34 = vsub.f32 1.5, %v256_v61  ;;  %v219_v5 = vmul.f32 %v171_v2, %v2122_v20  ;;  %v2353_v2 = vld [vmem:[%s3631_s2] ss:$0 sm:$0xff] }
 0x104   :  { %v2285_v7 = vpop.eup %1873  ;;  %v2288_v8 = vsub.f32 %v2161_v47, %v117_v3  ;;  %v2298_v47 = vadd.f32 1e-05, %v221_v10 }
 0x105   :  { %v1876_v9 = vpop.eup %1875  ;;  %v2291_v11 = vadd.f32 1e-05, %v219_v5  ;;  %v258_v13 = vmul.f32 %v1872_v50, %v257_v34  ;;  %v284_v14 = vmul.f32 %v2285_v7, %v2274_v51  ;;  %vm290_vm9 = vweird.f32 %v2285_v7 }
 0x106   :  { %v264_v12 = vmul.f32 %v1876_v9, %v236_v54  ;;  %v153_v16 = vmul.f32 %v2288_v8, %v2288_v8  ;;  %vm270_vm5 = vweird.f32 %v1876_v9  ;;  %vm2382_vm12 = vmor %vm289_vm8, %vm290_vm9  ;;  %vm299_vm1 = vweird.f32 %v2298_v47 }
 0x107   :  { %1877 = vrsqrt.f32 %v2291_v11  ;;  %v262_v27 = vsel %vm2300_vm4, %v1872_v50, %v258_v13  ;;  %v285_v28 = vmul.f32 %v2285_v7, %v284_v14  ;;  %vm271_vm7 = vmor %vm269_vm6, %vm270_vm5  ;;  %vm279_vm11 = vweird.f32 %v2291_v11 }
 0x108   :  { %v265_v15 = vmul.f32 %v1876_v9, %v264_v12  ;;  %v187_v24 = vsel %vm47_vm0, %v153_v16, 0.0  ;;  %1879 = vrsqrt.f32 %v2298_v47  ;;  %v433_v40 = vmul.f32 %v262_v27, %v2125_v25 }
 0x109   :  { %v83_v17 = vpop.xlane.xlu2 %82  ;;  %v180_v18 = vpop.xlane.xlu0 %179  ;;  %188 = vadd.xlane.f32.xlu1 %v187_v24 }
 0x10a   :  { %v266_v21 = vmul.f32 0.5, %v265_v15  ;;  %v120_v22 = vmul.f32 %v2122_v20, %v83_v17  ;;  %v77_v23 = vpop.xlane.xlu1 %76  ;;  %v222_v26 = vmul.f32 %v180_v18, %v2122_v20  ;;  %v454_v1 = vmul.f32 %v2334_v43, %v433_v40  ;;  %v2375_v15 = vld [vmem:[%s3629_s0 + $0x80] sm:$0xff] }
 0x10b   :  { %v118_v29 = vmul.f32 %v2122_v20, %v77_v23 }
 0x10c   :  { %v267_v30 = vsub.f32 1.5, %v266_v21  ;;  %v2312_v31 = vsub.f32 %v2177_v56, %v120_v22  ;;  %v2314_v32 = vadd.f32 1e-05, %v222_v26  ;;  %v96_v22 = vsel %vm47_vm0, %v2375_v15, 0.0 }
 0x10d   :  { %v2316_v33 = vpop.eup %1877  ;;  %v2320_v37 = vsub.f32 %v2182_v57, %v118_v29  ;;  %v286_v57 = vmul.f32 0.5, %v285_v28 }
 0x10e   :  { %v268_v41 = vmul.f32 %v1876_v9, %v267_v30  ;;  %v274_v56 = vmul.f32 %v2316_v33, %v2291_v11  ;;  %1881 = vrsqrt.f32 %v2314_v32  ;;  %v156_v44 = vmul.f32 %v2312_v31, %v2312_v31 }
 0x10f   :  { %v154_v25 = vmul.f32 %v2320_v37, %v2320_v37  ;;  %v287_v3 = vsub.f32 1.5, %v286_v57  ;;  %vm280_vm10 = vweird.f32 %v2316_v33  ;;  %v2412_v57 = vld [vmem:[%s3629_s0 + $0x88] sm:$0xff]  ;;  %vm309_vm14 = vweird.f32 %v2314_v32 }
 0x110   :  { %v272_v45 = vsel %vm271_vm7, %v1876_v9, %v268_v41  ;;  %v275_v46 = vmul.f32 %v2316_v33, %v274_v56  ;;  %v196_v54 = vsel %vm47_vm0, %v156_v44, 0.0  ;;  %vm281_vm13 = vmor %vm279_vm11, %vm280_vm10 }
 0x111   :  { %v434_v50 = vmul.f32 %v272_v45, %v2141_v36  ;;  %v86_v53 = vpop.xlane.xlu2 %85  ;;  %v2345_v55 = vpop.xlane.xlu0 %182  ;;  %197 = vadd.xlane.f32.xlu0 %v196_v54  ;;  %v190_v61 = vsel %vm47_vm0, %v154_v25, 0.0  ;;  %94 = vadd.xlane.f32.xlu1 %v93_v48  ;;  %v288_v17 = vmul.f32 %v2285_v7, %v287_v3 }
 0x112   :  { %v276_v59 = vmul.f32 0.5, %v275_v46  ;;  %v121_v60 = vmul.f32 %v2122_v20, %v86_v53  ;;  %v80_v62 = vpop.xlane.xlu1 %79  ;;  %v2355_v36 = vpop.eup %1879  ;;  %191 = vadd.xlane.f32.xlu2 %v190_v61  ;;  %v99_v46 = vsel %vm47_vm0, %v2412_v57, 0.0 }
 0x113   :  { %v119_v34 = vmul.f32 %v2122_v20, %v80_v62  ;;  %v455_v5 = vmul.f32 %v2334_v43, %v434_v50  ;;  %v292_v30 = vsel %vm2382_vm12, %v2285_v7, %v288_v17  ;;  %vm300_vm2 = vweird.f32 %v2355_v36 }
 0x114   :  { %v2359_v9 = vpop.eup %1881  ;;  %v277_v10 = vsub.f32 1.5, %v276_v59  ;;  %v2364_v12 = vsub.f32 %v2196_v63, %v121_v60  ;;  %v475_v63 = vadd.f32 %v2353_v2, %v454_v1  ;;  %v436_v44 = vmul.f32 %v292_v30, %v2139_v35  ;;  %vm301_vm4 = vmor %vm299_vm1, %vm300_vm2 }
 0x115   :  { %v304_v13 = vmul.f32 %v2359_v9, %v2314_v32  ;;  %v2370_v14 = vsub.f32 %v2201_v0, %v119_v34  ;;  %v476_v16 = vadd.f32 %v2353_v2, %v455_v5  ;;  %v294_v0 = vmul.f32 %v2355_v36, %v2298_v47 }
 0x116   :  { %v278_v51 = vmul.f32 %v2316_v33, %v277_v10  ;;  %v157_v19 = vmul.f32 %v2364_v12, %v2364_v12  ;;  %v457_v53 = vmul.f32 %v2334_v43, %v436_v44  ;;  %vm310_vm15 = vweird.f32 %v2359_v9 }
 0x117   :  { %v155_v21 = vmul.f32 %v2370_v14, %v2370_v14  ;;  %v493_v11 = vpack.c.bf16 %v476_v16, %v475_v63  ;;  %v305_v24 = vmul.f32 %v2359_v9, %v304_v13  ;;  %v295_v40 = vmul.f32 %v2355_v36, %v294_v0  ;;  %vm311_vm3 = vmor %vm309_vm14, %vm310_vm15 }
 0x118   :  { %v282_v23 = vsel %vm281_vm13, %v2316_v33, %v278_v51  ;;  %v199_v26 = vsel %vm47_vm0, %v157_v19, 0.0  ;;  %v478_v61 = vadd.f32 %v2353_v2, %v457_v53 }
 0x119   :  { %v193_v27 = vsel %vm47_vm0, %v155_v21, 0.0  ;;  %v89_v28 = vpop.xlane.xlu0 %88  ;;  %1723 = vmatmul.msk.bf16.vlgmr.msra.gmra.mxu0 %vm47_vm0, %v493_v11  ;;  %1732 = vmatmul.msk.bf16.vlgmr.msra.gmra.mxu1 %vm47_vm0, %v493_v11  ;;  %v435_v33 = vmul.f32 %v282_v23, %v2151_v42  ;;  %v306_v56 = vmul.f32 0.5, %v305_v24  ;;  %v296_v45 = vmul.f32 0.5, %v295_v40 }
 0x11a   :  { %v122_v29 = vmul.f32 %v2122_v20, %v89_v28  ;;  %200 = vadd.xlane.f32.xlu0 %v199_v26  ;;  %194 = vadd.xlane.f32.xlu2 %v193_v27 }
 0x11b   :  { %97 = vadd.xlane.f32.xlu1 %v96_v22  ;;  %v456_v42 = vmul.f32 %v2334_v43, %v435_v33  ;;  %v307_v25 = vsub.f32 1.5, %v306_v56  ;;  %v297_v54 = vsub.f32 1.5, %v296_v45 }
 0x11c   :  { %v2407_v41 = vsub.f32 %v2211_v4, %v122_v29 }
 0x11d   :  { %v477_v59 = vadd.f32 %v2353_v2, %v456_v42  ;;  %v308_v60 = vmul.f32 %v2359_v9, %v307_v25  ;;  %v298_v62 = vmul.f32 %v2355_v36, %v297_v54  ;;  %v1856_v42 = vld [vmem:[%s3633_s5 + $0x38] sm:$0xff] }
 0x11e   :  { %v158_v7 = vmul.f32 %v2407_v41, %v2407_v41  ;;  %v1864_v25 = vld [vmem:[%s3633_s5 + $0x78] sm:$0xff]  ;;  %1561 = vmatpush.bf16.msra.mxu2 %v1856_v42 }
 0x11f   :  { %v494_v1 = vpack.c.bf16 %v478_v61, %v477_v59  ;;  %v312_v3 = vsel %vm311_vm3, %v2359_v9, %v308_v60  ;;  %v302_v47 = vsel %vm301_vm4, %v2355_v36, %v298_v62  ;;  %v223_v36 = vmul.f32 %v2345_v55, %v2122_v20  ;;  %1615 = vmatpush.bf16.msra.mxu3 %v1864_v25 }
 0x120   :  { %v202_v4 = vsel %vm47_vm0, %v158_v7, 0.0  ;;  %v438_v34 = vmul.f32 %v312_v3, %v2165_v49  ;;  %v437_v5 = vmul.f32 %v302_v47, %v2143_v38 }
 0x121   :  { %v92_v48 = vpop.xlane.xlu0 %91  ;;  %v241_v16 = vadd.f32 1e-05, %v223_v36 }
 0x122   :  { %v123_v50 = vmul.f32 %v2122_v20, %v92_v48  ;;  %100 = vadd.xlane.f32.xlu2 %v99_v46  ;;  %v459_v10 = vmul.f32 %v2334_v43, %v438_v34  ;;  %v458_v13 = vmul.f32 %v2334_v43, %v437_v5 }
 0x123   :  { %203 = vadd.xlane.f32.xlu1 %v202_v4  ;;  %1883 = vrsqrt.f32 %v241_v16  ;;  %vm319_vm5 = vweird.f32 %v241_v16 }
 0x124   :  { %v2426_v35 = vsub.f32 %v2218_v6, %v123_v50  ;;  %v480_v51 = vadd.f32 %v2353_v2, %v459_v10  ;;  %v479_v63 = vadd.f32 %v2353_v2, %v458_v13 }
 0x126   :  { %v159_v32 = vmul.f32 %v2426_v35, %v2426_v35  ;;  %v495_v9 = vpack.c.bf16 %v480_v51, %v479_v63 }
 0x128   :  { %v205_v6 = vsel %vm47_vm0, %v159_v32, 0.0 }
 0x129   :  { %1724 = vmatmul.msk.bf16.gmra.mxu0 %vm47_vm0, %v494_v1  ;;  %1733 = vmatmul.msk.bf16.gmra.mxu1 %vm47_vm0, %v494_v1  ;;  %v1884_v49 = vpop.eup %1883 }
 0x12a   :  { %206 = vadd.xlane.f32.xlu2 %v205_v6  ;;  %v314_v38 = vmul.f32 %v1884_v49, %v241_v16  ;;  %vm320_vm6 = vweird.f32 %v1884_v49  ;;  %v510_v16 = vld [vmem:[%s3634_s4] sm:$0x3] }
 0x12b   :  { %vm2456_vm7 = vmor %vm319_vm5, %vm320_vm6 }
 0x12c   :  { %v315_v0 = vmul.f32 %v1884_v49, %v314_v38  ;;  %v1863_v38 = vld [vmem:[%s3633_s5 + $0x70] sm:$0xff] }
 0x12d   :  { %1616 = vmatpush.bf16.msra.mxu3 %v1863_v38 }
 0x12e   :  { %v316_v21 = vmul.f32 0.5, %v315_v0 }
 0x130   :  { %v317_v23 = vsub.f32 1.5, %v316_v21 }
 0x132   :  { %v318_v28 = vmul.f32 %v1884_v49, %v317_v23 }
 0x134   :  { %v322_v7 = vsel %vm2456_vm7, %v1884_v49, %v318_v28  ;;  %v1855_v49 = vld [vmem:[%s3633_s5 + $0x30] sm:$0xff] }
 0x135   :  { %v439_v59 = vmul.f32 %v322_v7, %v2184_v58  ;;  %1562 = vmatpush.bf16.msra.mxu2 %v1855_v49 }
 0x137   :  { %v460_v34 = vmul.f32 %v2334_v43, %v439_v59  ;;  %v1861_v59 = vld [vmem:[%s3633_s5 + $0x60] sm:$0xff] }
 0x139   :  { %1725 = vmatmul.msk.bf16.gmra.mxu0 %vm47_vm0, %v495_v9  ;;  %1734 = vmatmul.msk.bf16.gmra.mxu1 %vm47_vm0, %v495_v9  ;;  %v481_v0 = vadd.f32 %v2353_v2, %v460_v34  ;;  %v1860_v34 = vld [vmem:[%s3633_s5 + $0x58] sm:$0xff] }
 0x174   :  { %v186_v17 = vpop.xlane.xlu1 %185 }
 0x175   :  { %v224_v18 = vmul.f32 %v186_v17, %v2122_v20 }
 0x177   :  { %v242_v19 = vadd.f32 1e-05, %v224_v18 }
 0x179   :  { %1885 = vrsqrt.f32 %v242_v19  ;;  %vm329_vm9 = vweird.f32 %v242_v19 }
 0x17c   :  { %v189_v11 = vpop.xlane.xlu1 %188 }
 0x17d   :  { %v225_v24 = vmul.f32 %v189_v11, %v2122_v20 }
 0x17f   :  { %v1886_v22 = vpop.eup %1885  ;;  %v2453_v55 = vadd.f32 1e-05, %v225_v24 }
 0x180   :  { %v324_v26 = vmul.f32 %v1886_v22, %v242_v19  ;;  %vm330_vm8 = vweird.f32 %v1886_v22 }
 0x181   :  { %1887 = vrsqrt.f32 %v2453_v55  ;;  %vm331_vm10 = vmor %vm329_vm9, %vm330_vm8  ;;  %vm339_vm13 = vweird.f32 %v2453_v55 }
 0x182   :  { %v325_v27 = vmul.f32 %v1886_v22, %v324_v26  ;;  %v1862_v26 = vld [vmem:[%s3633_s5 + $0x68] sm:$0xff] }
 0x183   :  { %1617 = vmatpush.bf16.msra.mxu3 %v1862_v26 }
 0x184   :  { %v326_v30 = vmul.f32 0.5, %v325_v27  ;;  %v198_v40 = vpop.xlane.xlu0 %197  ;;  %v95_v44 = vpop.xlane.xlu1 %94 }
 0x185   :  { %v192_v56 = vpop.xlane.xlu2 %191  ;;  %v124_v46 = vmul.f32 %v2122_v20, %v95_v44  ;;  %v228_v48 = vmul.f32 %v198_v40, %v2122_v20 }
 0x186   :  { %v327_v33 = vsub.f32 1.5, %v326_v30  ;;  %v226_v45 = vmul.f32 %v192_v56, %v2122_v20  ;;  %v2529_v30 = vperm.slane %v510_v16, 1 }
 0x187   :  { %v2471_v50 = vpop.eup %1887  ;;  %v2476_v54 = vsub.f32 %v2325_v39, %v124_v46  ;;  %v2484_v1 = vadd.f32 1e-05, %v228_v48  ;;  %v1853_v48 = vld [vmem:[%s3633_s5 + $0x20] sm:$0xff]  ;;  %1618 = vmatpush.bf16.msra.mxu3 %v1861_v59 }
 0x188   :  { %v328_v4 = vmul.f32 %v1886_v22, %v327_v33  ;;  %v2473_v53 = vadd.f32 1e-05, %v226_v45  ;;  %v334_v61 = vmul.f32 %v2471_v50, %v2453_v55  ;;  %vm340_vm11 = vweird.f32 %v2471_v50 }
 0x189   :  { %v160_v39 = vmul.f32 %v2476_v54, %v2476_v54  ;;  %vm2553_vm15 = vmor %vm339_vm13, %vm340_vm11  ;;  %vm369_vm2 = vweird.f32 %v2484_v1 }
 0x18a   :  { %v332_v60 = vsel %vm331_vm10, %v1886_v22, %v328_v4  ;;  %1889 = vrsqrt.f32 %v2473_v53  ;;  %v335_v62 = vmul.f32 %v2471_v50, %v334_v61  ;;  %v2513_v22 = vperm.slane %v510_v16, 0 }
 0x18b   :  { %v440_v32 = vmul.f32 %v332_v60, %v2277_v52  ;;  %v208_v58 = vsel %vm47_vm0, %v160_v39, 0.0  ;;  %1891 = vrsqrt.f32 %v2484_v1  ;;  %vm349_vm14 = vweird.f32 %v2473_v53  ;;  %1619 = vmatpush.bf16.msra.mxu3 %v1860_v34 }
 0x18c   :  { %v336_v5 = vmul.f32 0.5, %v335_v62  ;;  %209 = vadd.xlane.f32.xlu0 %v208_v58 }
 0x18d   :  { %v461_v6 = vmul.f32 %v2334_v43, %v440_v32  ;;  %v195_v3 = vpop.xlane.xlu2 %194  ;;  %v201_v47 = vpop.xlane.xlu0 %200 }
 0x18e   :  { %v227_v52 = vmul.f32 %v195_v3, %v2122_v20  ;;  %v98_v10 = vpop.xlane.xlu1 %97  ;;  %v229_v36 = vmul.f32 %v201_v47, %v2122_v20  ;;  %v337_v19 = vsub.f32 1.5, %v336_v5 }
 0x18f   :  { %v125_v13 = vmul.f32 %v2122_v20, %v98_v10  ;;  %v482_v51 = vadd.f32 %v2353_v2, %v461_v6 }
 0x190   :  { %v1890_v63 = vpop.eup %1889  ;;  %v2495_v9 = vadd.f32 1e-05, %v227_v52  ;;  %v2515_v23 = vadd.f32 1e-05, %v229_v36  ;;  %v338_v40 = vmul.f32 %v2471_v50, %v337_v19 }
 0x191   :  { %v344_v17 = vmul.f32 %v1890_v63, %v2473_v53  ;;  %v2509_v18 = vsub.f32 %v2375_v15, %v125_v13  ;;  %v496_v11 = vpack.c.bf16 %v482_v51, %v481_v0  ;;  %v1854_v15 = vld [vmem:[%s3633_s5 + $0x28] sm:$0xff]  ;;  %v2525_v27 = vpop.eup %1891  ;;  %vm350_vm12 = vweird.f32 %v1890_v63 }
 0x192   :  { %1893 = vrsqrt.f32 %v2495_v9  ;;  %1563 = vmatpush.bf16.msra.mxu2 %v1854_v15  ;;  %v364_v4 = vmul.f32 %v2525_v27, %v2484_v1  ;;  %v342_v62 = vsel %vm2553_vm15, %v2471_v50, %v338_v40  ;;  %vm351_vm1 = vmor %vm349_vm14, %vm350_vm12  ;;  %v1852_v50 = vld [vmem:[%s3633_s5 + $0x18] sm:$0xff]  ;;  %v1859_v40 = vld [vmem:[%s3633_s5 + $0x50] sm:$0xff]  ;;  %vm370_vm3 = vweird.f32 %v2525_v27 }
 0x193   :  { %v345_v21 = vmul.f32 %v1890_v63, %v344_v17  ;;  %v161_v24 = vmul.f32 %v2509_v18, %v2509_v18  ;;  %1726 = vmatmul.msk.bf16.gmra.mxu0 %vm47_vm0, %v496_v11  ;;  %1735 = vmatmul.msk.bf16.gmra.mxu1 %vm47_vm0, %v496_v11  ;;  %1895 = vrsqrt.f32 %v2515_v23  ;;  %v441_v5 = vmul.f32 %v342_v62, %v2288_v8  ;;  %v1850_v62 = vld [vmem:[%s3633_s5 + $0x8] sm:$0xff]  ;;  %vm2635_vm5 = vmor %vm369_vm2, %vm370_vm3 }
 0x194   :  { %v365_v47 = vmul.f32 %v2525_v27, %v364_v4  ;;  %1620 = vmatpush.bf16.msra.mxu3 %v1859_v40  ;;  %vm359_vm6 = vweird.f32 %v2495_v9  ;;  %vm379_vm8 = vweird.f32 %v2515_v23 }
 0x195   :  { %v346_v28 = vmul.f32 0.5, %v345_v21  ;;  %v101_v29 = vpop.xlane.xlu2 %100  ;;  %v211_v56 = vsel %vm47_vm0, %v161_v24, 0.0  ;;  %v462_v21 = vmul.f32 %v2334_v43, %v441_v5  ;;  %v1849_v5 = vld [vmem:[%s3633_s5] sm:$0xff] }
 0x196   :  { %v126_v33 = vmul.f32 %v2122_v20, %v101_v29  ;;  %v592_v44 = vpop.f32.mrf.mxu0  ;;  %212 = vadd.xlane.f32.xlu1 %v211_v56  ;;  %v204_v45 = vpop.xlane.xlu1 %203  ;;  %1564 = vmatpush.bf16.msra.mxu2 %v1853_v48  ;;  %v366_v38 = vmul.f32 0.5, %v365_v47  ;;  %v1851_v29 = vld [vmem:[%s3633_s5 + $0x10] sm:$0xff] }
 0x197   :  { %v347_v7 = vsub.f32 1.5, %v346_v28  ;;  %v2536_v46 = vadd.f32 %v592_v44, %v2513_v22  ;;  %v646_v42 = vpop.f32.mrf.mxu1  ;;  %v230_v39 = vmul.f32 %v204_v45, %v2122_v20 }
 0x198   :  { %v2538_v25 = vpop.eup %1893  ;;  %v2560_v61 = vsub.f32 %v2412_v57, %v126_v33  ;;  %v2563_v32 = vadd.f32 %v646_v42, %v2529_v30  ;;  %v367_v26 = vsub.f32 1.5, %v366_v38 }
 0x199   :  { %v348_v55 = vmul.f32 %v1890_v63, %v347_v7  ;;  %v354_v53 = vmul.f32 %v2538_v25, %v2495_v9  ;;  %v1741_v6 = vmul.f32 -1.442695, %v2536_v46  ;;  %v2584_v13 = vpop.eup %1895  ;;  %v2586_v51 = vadd.f32 1e-05, %v230_v39  ;;  %v1858_v39 = vld [vmem:[%s3633_s5 + $0x48] sm:$0xff] }
 0x19a   :  { %v1742_v52 = vmul.f32 -1.442695, %v2563_v32  ;;  %v162_v10 = vmul.f32 %v2560_v61, %v2560_v61  ;;  %1565 = vmatpush.bf16.msra.mxu2 %v1852_v50  ;;  %v374_v0 = vmul.f32 %v2584_v13, %v2515_v23  ;;  %v483_v7 = vadd.f32 %v2353_v2, %v462_v21  ;;  %1621 = vmatpush.bf16.msra.mxu3 %v1858_v39 }
 0x19b   :  { %v352_v3 = vsel %vm351_vm1, %v1890_v63, %v348_v55  ;;  %v355_v58 = vmul.f32 %v2538_v25, %v354_v53  ;;  %1897 = vpow2.f32 %v1741_v6  ;;  %vm360_vm4 = vweird.f32 %v2538_v25 }
 0x19c   :  { %v442_v57 = vmul.f32 %v352_v3, %v2320_v37  ;;  %1899 = vpow2.f32 %v1742_v52  ;;  %v214_v36 = vsel %vm47_vm0, %v162_v10, 0.0  ;;  %v375_v56 = vmul.f32 %v2584_v13, %v374_v0  ;;  %vm361_vm7 = vmor %vm359_vm6, %vm360_vm4 }
 0x19d   :  { %v356_v37 = vmul.f32 0.5, %v355_v58  ;;  %215 = vadd.xlane.f32.xlu2 %v214_v36  ;;  %1901 = vrsqrt.f32 %v2586_v51  ;;  %v368_v53 = vmul.f32 %v2525_v27, %v367_v26  ;;  %vm380_vm9 = vweird.f32 %v2584_v13 }
 0x19e   :  { %v594_v63 = vpop.f32.mrf.mxu0  ;;  %v463_v49 = vmul.f32 %v2334_v43, %v442_v57  ;;  %1566 = vmatpush.bf16.msra.mxu2 %v1851_v29  ;;  %v376_v58 = vmul.f32 0.5, %v375_v56  ;;  %vm2680_vm10 = vmor %vm379_vm8, %vm380_vm9  ;;  %vm389_vm11 = vweird.f32 %v2586_v51 }
 0x19f   :  { %v2590_v16 = vadd.f32 %v594_v63, %v2513_v22  ;;  %v648_v8 = vpop.f32.mrf.mxu1  ;;  %v357_v24 = vsub.f32 1.5, %v356_v37  ;;  %v372_v50 = vsel %vm2635_vm5, %v2525_v27, %v368_v53 }
 0x1a0   :  { %v2594_v17 = vadd.f32 %v648_v8, %v2529_v30  ;;  %v484_v15 = vadd.f32 %v2353_v2, %v463_v49  ;;  %v377_v52 = vsub.f32 1.5, %v376_v58  ;;  %v444_v8 = vmul.f32 %v372_v50, %v2312_v31 }
 0x1a1   :  { %v1743_v19 = vmul.f32 -1.442695, %v2590_v16  ;;  %v1898_v11 = vpop.eup %1897  ;;  %v358_v4 = vmul.f32 %v2538_v25, %v357_v24 }
 0x1a2   :  { %v1744_v28 = vmul.f32 -1.442695, %v2594_v17  ;;  %v1900_v33 = vpop.eup %1899  ;;  %v2610_v44 = vadd.f32 1.0, %v1898_v11  ;;  %v497_v48 = vpack.c.bf16 %v484_v15, %v483_v7  ;;  %1567 = vmatpush.bf16.msra.mxu2 %v1850_v62  ;;  %v378_v0 = vmul.f32 %v2584_v13, %v377_v52 }
 0x1a3   :  { %1903 = vpow2.f32 %v1743_v19  ;;  %v2615_v45 = vadd.f32 1.0, %v1900_v33  ;;  %v2622_v55 = vpop.eup %1901  ;;  %v362_v1 = vsel %vm361_vm7, %v2538_v25, %v358_v4  ;;  %v1857_v25 = vld [vmem:[%s3633_s5 + $0x40] sm:$0xff] }
 0x1a4   :  { %1905 = vpow2.f32 %v1744_v28  ;;  %1727 = vmatmul.msk.bf16.gmra.mxu0 %vm47_vm0, %v497_v48  ;;  %1736 = vmatmul.msk.bf16.gmra.mxu1 %vm47_vm0, %v497_v48  ;;  %v384_v34 = vmul.f32 %v2622_v55, %v2586_v51  ;;  %v443_v10 = vmul.f32 %v362_v1, %v2370_v14  ;;  %v465_v28 = vmul.f32 %v2334_v43, %v444_v8 }
 0x1a5   :  { %1907 = vrcp.f32 %v2610_v44  ;;  %1622 = vmatpush.bf16.msra.mxu3 %v1857_v25  ;;  %v382_v33 = vsel %vm2680_vm10, %v2584_v13, %v378_v0  ;;  %v846_v56 = vand.u32 2147483648, %v2610_v44  ;;  %vm390_vm12 = vweird.f32 %v2622_v55 }
 0x1a6   :  { %v597_v42 = vpop.f32.mrf.mxu0  ;;  %1909 = vrcp.f32 %v2615_v45  ;;  %1568 = vmatpush.bf16.msra.mxu2 %v1849_v5  ;;  %v385_v14 = vmul.f32 %v2622_v55, %v384_v34  ;;  %v464_v24 = vmul.f32 %v2334_v43, %v443_v10  ;;  %v486_v39 = vadd.f32 %v2353_v2, %v465_v28  ;;  %vm2744_vm1 = vmor %vm389_vm11, %vm390_vm12 }
 0x1a7   :  { %v2620_v59 = vadd.f32 %v597_v42, %v2513_v22  ;;  %v651_v60 = vpop.f32.mrf.mxu1  ;;  %v2713_v3 = vmul.f32 %v382_v33, %v2364_v12  ;;  %v844_v1 = vand.u32 2147483647, %v2610_v44  ;;  %vm840_vm13 = vweird.f32 %v2610_v44 }
 0x1a8   :  { %v2666_v27 = vadd.f32 %v651_v60, %v2529_v30  ;;  %v386_v29 = vmul.f32 0.5, %v385_v14  ;;  %v485_v60 = vadd.f32 %v2353_v2, %v464_v24  ;;  %vm855_vm14 = vweird.f32 %v2615_v45 }
 0x1a9   :  { %v1904_v6 = vpop.eup %1903  ;;  %v1745_v9 = vmul.f32 -1.442695, %v2620_v59  ;;  %vm2729_vm15 = vcmp.eq.f32.partialorder %v844_v1, 8.507059e+37  ;;  %v859_v14 = vand.u32 2147483647, %v2615_v45 }
 0x1aa   :  { %v2646_v57 = vadd.f32 1.0, %v1904_v6  ;;  %v1906_v47 = vpop.eup %1905  ;;  %v1746_v23 = vmul.f32 -1.442695, %v2666_v27  ;;  %v387_v58 = vsub.f32 1.5, %v386_v29  ;;  %v498_v25 = vpack.c.bf16 %v486_v39, %v485_v60 }
 0x1ab   :  { %v2663_v37 = vadd.f32 1.0, %v1906_v47  ;;  %v2668_v36 = vpop.eup %1907  ;;  %vm860_vm9 = vcmp.eq.f32.partialorder %v859_v14, 8.507059e+37 }
 0x1ac   :  { %1911 = vrcp.f32 %v2646_v57  ;;  %v2673_v38 = vpop.eup %1909  ;;  %v836_v31 = vmul.f32 %v2668_v36, %v2610_v44  ;;  %v388_v8 = vmul.f32 %v2622_v55, %v387_v58  ;;  %vm841_vm2 = vweird.f32 %v2668_v36 }
 0x1ad   :  { %1913 = vpow2.f32 %v1745_v9  ;;  %v851_v15 = vmul.f32 %v2673_v38, %v2615_v45  ;;  %v2718_v9 = vor.u32 1.1754944e-38, %v846_v56  ;;  %vm856_vm3 = vweird.f32 %v2673_v38  ;;  %vm2768_vm5 = vmor %vm840_vm13, %vm841_vm2 }
 0x1ae   :  { %v599_v63 = vpop.f32.mrf.mxu0  ;;  %1915 = vrcp.f32 %v2663_v37  ;;  %v837_v4 = vsub.f32 1.0, %v836_v31  ;;  %v392_v56 = vsel %vm2744_vm1, %v2622_v55, %v388_v8  ;;  %vm870_vm4 = vweird.f32 %v2646_v57  ;;  %vm2783_vm7 = vmor %vm855_vm14, %vm856_vm3 }
 0x1af   :  { %v653_v49 = vpop.f32.mrf.mxu1  ;;  %v2688_v11 = vadd.f32 %v599_v63, %v2513_v22  ;;  %1917 = vpow2.f32 %v1746_v23  ;;  %v852_v53 = vsub.f32 1.0, %v851_v15  ;;  %v861_v23 = vand.u32 2147483648, %v2615_v45 }
 0x1b0   :  { %v2694_v26 = vadd.f32 %v653_v49, %v2529_v30  ;;  %v838_v5 = vmul.f32 %v2668_v36, %v837_v4  ;;  %v876_v4 = vand.u32 2147483648, %v2646_v57  ;;  %v891_v39 = vand.u32 2147483648, %v2663_v37 }
 0x1b1   :  { %v1747_v48 = vmul.f32 -1.442695, %v2688_v11  ;;  %v853_v52 = vmul.f32 %v2673_v38, %v852_v53  ;;  %vm885_vm11 = vweird.f32 %v2663_v37 }
 0x1b2   :  { %v2678_v19 = vpop.eup %1911  ;;  %v1748_v13 = vmul.f32 -1.442695, %v2694_v26  ;;  %v839_v28 = vadd.f32 %v2668_v36, %v838_v5  ;;  %v862_v5 = vor.u32 1.1754944e-38, %v861_v23 }
 0x1b3   :  { %v1914_v40 = vpop.eup %1913  ;;  %v866_v7 = vmul.f32 %v2678_v19, %v2646_v57  ;;  %1919 = vpow2.f32 %v1747_v48  ;;  %v854_v51 = vadd.f32 %v2673_v38, %v853_v52  ;;  %vm871_vm6 = vweird.f32 %v2678_v19 }
 0x1b4   :  { %v2704_v42 = vpop.eup %1915  ;;  %v2720_v50 = vadd.f32 1.0, %v1914_v40  ;;  %1921 = vpow2.f32 %v1748_v13  ;;  %1728 = vmatmul.msk.bf16.gmra.mxu0 %vm47_vm0, %v498_v25  ;;  %1737 = vmatmul.msk.bf16.gmra.mxu1 %vm47_vm0, %v498_v25  ;;  %v843_v55 = vsel %vm2768_vm5, %v2668_v36, %v839_v28  ;;  %v889_v13 = vand.u32 2147483647, %v2663_v37  ;;  %vm2804_vm10 = vmor %vm870_vm4, %vm871_vm6 }
 0x1b5   :  { %v881_v62 = vmul.f32 %v2704_v42, %v2663_v37  ;;  %v867_v47 = vsub.f32 1.0, %v866_v7  ;;  %v1918_v63 = vpop.eup %1917  ;;  %v874_v7 = vand.u32 2147483647, %v2646_v57  ;;  %v858_v36 = vsel %vm2783_vm7, %v2673_v38, %v854_v51 }
 0x1b6   :  { %v602_v6 = vpop.f32.mrf.mxu0  ;;  %1923 = vrcp.f32 %v2720_v50  ;;  %v2751_v15 = vadd.f32 1.0, %v1918_v63  ;;  %vm886_vm8 = vweird.f32 %v2704_v42  ;;  %v848_v52 = vsel %vm2729_vm15, %v2718_v9, %v843_v55 }
 0x1b7   :  { %v656_v34 = vpop.f32.mrf.mxu1  ;;  %v2724_v12 = vadd.f32 %v602_v6, %v2513_v22  ;;  %v882_v10 = vsub.f32 1.0, %v881_v62  ;;  %v868_v24 = vmul.f32 %v2678_v19, %v867_v47  ;;  %vm875_vm12 = vcmp.eq.f32.partialorder %v874_v7, 8.507059e+37  ;;  %vm2823_vm13 = vmor %vm885_vm11, %vm886_vm8 }
 0x1b8   :  { %v2738_v21 = vadd.f32 %v656_v34, %v2529_v30  ;;  %v446_v34 = vmul.f32 %v392_v56, %v2407_v41  ;;  %v877_v63 = vor.u32 1.1754944e-38, %v876_v4  ;;  %vm890_vm14 = vcmp.eq.f32.partialorder %v889_v13, 8.507059e+37 }
 0x1b9   :  { %v1749_v0 = vmul.f32 -1.442695, %v2724_v12  ;;  %v883_v40 = vmul.f32 %v2704_v42, %v882_v10  ;;  %v1920_v33 = vpop.eup %1919  ;;  %v869_v53 = vadd.f32 %v2678_v19, %v868_v24  ;;  %v863_v10 = vsel %vm860_vm9, %v862_v5, %v858_v36 }
 0x1ba   :  { %v1750_v29 = vmul.f32 -1.442695, %v2738_v21  ;;  %v1922_v48 = vpop.eup %1921  ;;  %v2774_v62 = vadd.f32 1.0, %v1920_v33  ;;  %v1375_v31 = vmul.f32 %v848_v52, %v2536_v46  ;;  %v466_v28 = vmul.f32 %v2334_v43, %v2713_v3 }
 0x1bb   :  { %1925 = vpow2.f32 %v1749_v0  ;;  %v2789_v6 = vadd.f32 1.0, %v1922_v48  ;;  %v884_v47 = vadd.f32 %v2704_v42, %v883_v40  ;;  %v873_v41 = vsel %vm2804_vm10, %v2678_v19, %v869_v53 }
 0x1bc   :  { %1927 = vrcp.f32 %v2751_v15  ;;  %v2791_v1 = vpop.eup %1923  ;;  %v892_v19 = vor.u32 1.1754944e-38, %v891_v39  ;;  %v878_v23 = vsel %vm875_vm12, %v877_v63, %v873_v41  ;;  %v1376_v51 = vmul.f32 %v863_v10, %v2563_v32 }
 0x1bd   :  { %1929 = vpow2.f32 %v1750_v29  ;;  %v896_v9 = vmul.f32 %v2791_v1, %v2720_v50  ;;  %v888_v37 = vsel %vm2823_vm13, %v2704_v42, %v884_v47  ;;  %v904_v40 = vand.u32 2147483647, %v2720_v50 }
 0x1be   :  { %v604_v58 = vpop.f32.mrf.mxu0  ;;  %1931 = vrcp.f32 %v2774_v62  ;;  %v893_v46 = vsel %vm890_vm14, %v892_v19, %v888_v37  ;;  %v1377_v3 = vmul.f32 %v878_v23, %v2590_v16  ;;  %v906_v32 = vand.u32 2147483648, %v2720_v50 }
 0x1bf   :  { %1933 = vrcp.f32 %v2789_v6  ;;  %v2819_v57 = vadd.f32 %v604_v58, %v2513_v22  ;;  %v658_v49 = vpop.f32.mrf.mxu1  ;;  %v897_v7 = vsub.f32 1.0, %v896_v9  ;;  %vm900_vm15 = vweird.f32 %v2720_v50 }
 0x1c0   :  { %v2845_v33 = vadd.f32 %v658_v49, %v2529_v30  ;;  %v467_v44 = vmul.f32 %v2334_v43, %v446_v34  ;;  %v487_v13 = vadd.f32 %v2353_v2, %v466_v28  ;;  %v1378_v39 = vmul.f32 %v893_v46, %v2594_v17 }
 0x1c1   :  { %v1926_v45 = vpop.eup %1925  ;;  %v1751_v42 = vmul.f32 -1.442695, %v2819_v57  ;;  %v898_v36 = vmul.f32 %v2791_v1, %v897_v7  ;;  %vm901_vm1 = vweird.f32 %v2791_v1  ;;  %vm930_vm2 = vweird.f32 %v2774_v62 }
 0x1c2   :  { %v2809_v38 = vpop.eup %1927  ;;  %v2835_v24 = vadd.f32 1.0, %v1926_v45  ;;  %v1752_v16 = vmul.f32 -1.442695, %v2845_v33  ;;  %v934_v43 = vand.u32 2147483647, %v2774_v62  ;;  %v1411_v25 = vpack.c.bf16 %v1377_v3, %v1375_v31  ;;  %vm2910_vm10 = vmor %vm900_vm15, %vm901_vm1 }
 0x1c3   :  { %v1930_v14 = vpop.eup %1929  ;;  %v911_v0 = vmul.f32 %v2809_v38, %v2751_v15  ;;  %v1412_v52 = vpack.c.bf16 %v1378_v39, %v1376_v51  ;;  %v488_v41 = vadd.f32 %v2353_v2, %v467_v44  ;;  %v936_v63 = vand.u32 2147483648, %v2774_v62 }
 0x1c4   :  { %v2839_v29 = vpop.eup %1931  ;;  %v2851_v48 = vadd.f32 1.0, %v1930_v14  ;;  %1935 = vrcp.f32 %v2835_v24  ;;  %vm945_vm5 = vweird.f32 %v2789_v6  ;;  %v949_v8 = vand.u32 2147483647, %v2789_v6  ;;  %1569 = vmatmul.bf16.vlgmr.msra.gmra.mxu2 %v1411_v25 }
 0x1c5   :  { %v2847_v56 = vpop.eup %1933  ;;  %v926_v4 = vmul.f32 %v2839_v29, %v2774_v62  ;;  %v912_v60 = vsub.f32 1.0, %v911_v0  ;;  %1937 = vpow2.f32 %v1751_v42  ;;  %vm931_vm3 = vweird.f32 %v2839_v29  ;;  %1623 = vmatmul.bf16.vlgmr.msra.gmra.mxu3 %v1412_v52 }
 0x1c6   :  { %v941_v53 = vmul.f32 %v2847_v56, %v2789_v6  ;;  %1939 = vrcp.f32 %v2851_v48  ;;  %vm946_vm4 = vweird.f32 %v2847_v56  ;;  %v951_v9 = vand.u32 2147483648, %v2789_v6  ;;  %vm2889_vm7 = vmor %vm930_vm2, %vm931_vm3 }
 0x1c7   :  { %v927_v55 = vsub.f32 1.0, %v926_v4  ;;  %v913_v45 = vmul.f32 %v2809_v38, %v912_v60  ;;  %1941 = vpow2.f32 %v1752_v16  ;;  %v899_v14 = vadd.f32 %v2791_v1, %v898_v36  ;;  %vm2902_vm9 = vmor %vm945_vm5, %vm946_vm4 }
 0x1c8   :  { %v942_v58 = vsub.f32 1.0, %v941_v53  ;;  %vm916_vm6 = vweird.f32 %v2809_v38  ;;  %v499_v19 = vpack.c.bf16 %v488_v41, %v487_v13  ;;  %v907_v31 = vor.u32 1.1754944e-38, %v906_v32 }
 0x1c9   :  { %v928_v47 = vmul.f32 %v2839_v29, %v927_v55  ;;  %v914_v37 = vadd.f32 %v2809_v38, %v913_v45  ;;  %vm915_vm8 = vweird.f32 %v2751_v15  ;;  %v919_v23 = vand.u32 2147483647, %v2751_v15 }
 0x1ca   :  { %v943_v17 = vmul.f32 %v2847_v56, %v942_v58  ;;  %v2876_v10 = vpop.eup %1935  ;;  %v921_v28 = vand.u32 2147483648, %v2751_v15  ;;  %vm2917_vm11 = vcmp.eq.f32.partialorder %v934_v43, 8.507059e+37  ;;  %1729 = vmatmul.msk.bf16.gmra.mxu0 %vm47_vm0, %v499_v19  ;;  %1738 = vmatmul.msk.bf16.gmra.mxu1 %vm47_vm0, %v499_v19  ;;  %vm2930_vm12 = vmor %vm915_vm8, %vm916_vm6  ;;  %vm950_vm13 = vcmp.eq.f32.partialorder %v949_v8, 8.507059e+37 }
 0x1cb   :  { %v929_v34 = vadd.f32 %v2839_v29, %v928_v47  ;;  %v1938_v49 = vpop.eup %1937  ;;  %v952_v3 = vor.u32 1.1754944e-38, %v951_v9  ;;  %v956_v32 = vmul.f32 %v2876_v10, %v2835_v24  ;;  %v918_v60 = vsel %vm2930_vm12, %v2809_v38, %v914_v37 }
 0x1cc   :  { %v944_v5 = vadd.f32 %v2847_v56, %v943_v17  ;;  %v2893_v0 = vpop.eup %1939  ;;  %v2924_v46 = vadd.f32 1.0, %v1938_v49  ;;  %v922_v55 = vor.u32 1.1754944e-38, %v921_v28  ;;  %vm905_vm14 = vcmp.eq.f32.partialorder %v904_v40, 8.507059e+37 }
 0x1cd   :  { %v933_v15 = vsel %vm2889_vm7, %v2839_v29, %v929_v34  ;;  %v1942_v7 = vpop.eup %1941  ;;  %v937_v29 = vor.u32 1.1754944e-38, %v936_v63  ;;  %v971_v53 = vmul.f32 %v2893_v0, %v2851_v48  ;;  %vm920_vm15 = vcmp.eq.f32.partialorder %v919_v23, 8.507059e+37 }
 0x1ce   :  { %v948_v6 = vsel %vm2902_vm9, %v2847_v56, %v944_v5  ;;  %v903_v56 = vsel %vm2910_vm10, %v2791_v1, %v899_v14  ;;  %1943 = vrcp.f32 %v2924_v46  ;;  %v2947_v39 = vadd.f32 1.0, %v1942_v7 }
 0x1cf   :  { %v938_v44 = vsel %vm2917_vm11, %v937_v29, %v933_v15  ;;  %v953_v13 = vsel %vm950_vm13, %v952_v3, %v948_v6  ;;  %v908_v1 = vsel %vm905_vm14, %v907_v31, %v903_v56  ;;  %v923_v58 = vsel %vm920_vm15, %v922_v55, %v918_v60 }
 0x1d0   :  { %v957_v16 = vsub.f32 1.0, %v956_v32  ;;  %1945 = vrcp.f32 %v2947_v39  ;;  %v1381_v38 = vmul.f32 %v938_v44, %v2688_v11  ;;  %v1382_v36 = vmul.f32 %v953_v13, %v2694_v26 }
 0x1d1   :  { %v972_v47 = vsub.f32 1.0, %v971_v53  ;;  %v1379_v43 = vmul.f32 %v908_v1, %v2620_v59  ;;  %v1380_v17 = vmul.f32 %v923_v58, %v2666_v27  ;;  %vm960_vm1 = vweird.f32 %v2835_v24 }
 0x1d2   :  { %v958_v34 = vmul.f32 %v2876_v10, %v957_v16  ;;  %v964_v11 = vand.u32 2147483647, %v2835_v24  ;;  %vm961_vm2 = vweird.f32 %v2876_v10  ;;  %v966_v59 = vand.u32 2147483648, %v2835_v24 }
 0x1d3   :  { %v973_v40 = vmul.f32 %v2893_v0, %v972_v47  ;;  %v1413_v5 = vpack.c.bf16 %v1381_v38, %v1379_v43  ;;  %v1414_v25 = vpack.c.bf16 %v1382_v36, %v1380_v17  ;;  %vm975_vm3 = vweird.f32 %v2851_v48  ;;  %vm2974_vm6 = vmor %vm960_vm1, %vm961_vm2 }
 0x1d4   :  { %v1944_v45 = vpop.eup %1943  ;;  %v959_v41 = vadd.f32 %v2876_v10, %v958_v34  ;;  %v996_v8 = vand.u32 2147483648, %v2924_v46  ;;  %vm976_vm5 = vweird.f32 %v2893_v0  ;;  %v994_v49 = vand.u32 2147483647, %v2924_v46 }
 0x1d5   :  { %v986_v50 = vmul.f32 %v1944_v45, %v2924_v46  ;;  %vm991_vm4 = vweird.f32 %v1944_v45  ;;  %v974_v9 = vadd.f32 %v2893_v0, %v973_v40  ;;  %1574 = vmatmul.bf16.gmra.mxu2 %v1413_v5  ;;  %1628 = vmatmul.bf16.gmra.mxu3 %v1414_v25  ;;  %v981_v2 = vand.u32 2147483648, %v2851_v48  ;;  %vm2991_vm10 = vmor %vm975_vm3, %vm976_vm5 }
 0x1d6   :  { %v1946_v52 = vpop.eup %1945  ;;  %vm990_vm7 = vweird.f32 %v2924_v46  ;;  %v1011_v31 = vand.u32 2147483648, %v2947_v39  ;;  %v979_v23 = vand.u32 2147483647, %v2851_v48  ;;  %v1009_v62 = vand.u32 2147483647, %v2947_v39  ;;  %v207_v48 = vpop.xlane.xlu2 %206 }
 0x1d7   :  { %v987_v26 = vsub.f32 1.0, %v986_v50  ;;  %v1001_v27 = vmul.f32 %v1946_v52, %v2947_v39  ;;  %vm992_vm8 = vmor %vm990_vm7, %vm991_vm4  ;;  %vm1006_vm9 = vweird.f32 %v1946_v52  ;;  %v963_v24 = vsel %vm2974_vm6, %v2876_v10, %v959_v41 }
 0x1d8   :  { %v997_v42 = vor.u32 1.1754944e-38, %v996_v8  ;;  %v978_v6 = vsel %vm2991_vm10, %v2893_v0, %v974_v9  ;;  %vm995_vm11 = vcmp.eq.f32.partialorder %v994_v49, 8.507059e+37  ;;  %vm1005_vm12 = vweird.f32 %v2947_v39 }
 0x1d9   :  { %v988_v63 = vmul.f32 %v1944_v45, %v987_v26  ;;  %v1002_v14 = vsub.f32 1.0, %v1001_v27  ;;  %v967_v7 = vor.u32 1.1754944e-38, %v966_v59  ;;  %v982_v10 = vor.u32 1.1754944e-38, %v981_v2  ;;  %vm1007_vm13 = vmor %vm1005_vm12, %vm1006_vm9 }
 0x1da   :  { %v1012_v29 = vor.u32 1.1754944e-38, %v1011_v31  ;;  %vm965_vm14 = vcmp.eq.f32.partialorder %v964_v11, 8.507059e+37  ;;  %vm980_vm15 = vcmp.eq.f32.partialorder %v979_v23, 8.507059e+37  ;;  %vm1010_vm1 = vcmp.eq.f32.partialorder %v1009_v62, 8.507059e+37 }
 0x1db   :  { %v989_v19 = vadd.f32 %v1944_v45, %v988_v63  ;;  %v1003_v28 = vmul.f32 %v1946_v52, %v1002_v14  ;;  %v968_v32 = vsel %vm965_vm14, %v967_v7, %v963_v24  ;;  %v983_v56 = vsel %vm980_vm15, %v982_v10, %v978_v6  ;;  %v3033_v7 = vld [vmem:[%s3631_s2] ss:$0 sm:$0xff] }
 0x1dc   :  { %v231_v55 = vmul.f32 %v207_v48, %v2122_v20  ;;  %v1383_v44 = vmul.f32 %v968_v32, %v2724_v12  ;;  %v1384_v13 = vmul.f32 %v983_v56, %v2738_v21 }
 0x1dd   :  { %v993_v15 = vsel %vm992_vm8, %v1944_v45, %v989_v19  ;;  %v1004_v46 = vadd.f32 %v1946_v52, %v1003_v28 }
 0x1de   :  { %v998_v4 = vsel %vm995_vm11, %v997_v42, %v993_v15  ;;  %v249_v58 = vadd.f32 1e-05, %v231_v55 }
 0x1df   :  { %v1008_v3 = vsel %vm1007_vm13, %v1946_v52, %v1004_v46  ;;  %v1385_v53 = vmul.f32 %v998_v4, %v2819_v57 }
 0x1e0   :  { %v1013_v60 = vsel %vm1010_vm1, %v1012_v29, %v1008_v3  ;;  %1947 = vrsqrt.f32 %v249_v58  ;;  %vm399_vm2 = vweird.f32 %v249_v58 }
 0x1e1   :  { %v1386_v0 = vmul.f32 %v1013_v60, %v2845_v33  ;;  %v1415_v39 = vpack.c.bf16 %v1385_v53, %v1383_v44 }
 0x1e3   :  { %v1416_v1 = vpack.c.bf16 %v1386_v0, %v1384_v13 }
 0x1e5   :  { %1579 = vmatmul.bf16.gmra.mxu2 %v1415_v39  ;;  %1633 = vmatmul.bf16.gmra.mxu3 %v1416_v1 }
 0x1e6   :  { %v1948_v16 = vpop.eup %1947 }
 0x1e7   :  { %v394_v38 = vmul.f32 %v1948_v16, %v249_v58  ;;  %vm400_vm3 = vweird.f32 %v1948_v16 }
 0x1e8   :  { %vm401_vm4 = vmor %vm399_vm2, %vm400_vm3 }
 0x1e9   :  { %v395_v36 = vmul.f32 %v1948_v16, %v394_v38 }
 0x1eb   :  { %v396_v33 = vmul.f32 0.5, %v395_v36 }
 0x1ed   :  { %v397_v43 = vsub.f32 1.5, %v396_v33 }
 0x1ef   :  { %v398_v34 = vmul.f32 %v1948_v16, %v397_v43 }
 0x1f1   :  { %v402_v25 = vsel %vm401_vm4, %v1948_v16, %v398_v34 }
 0x1f2   :  { %v447_v8 = vmul.f32 %v402_v25, %v2426_v35 }
 0x1ff   :  { %v210_v47 = vpop.xlane.xlu0 %209 }
 0x200   :  { %v232_v57 = vmul.f32 %v210_v47, %v2122_v20 }
 0x202   :  { %v250_v45 = vadd.f32 1e-05, %v232_v57 }
 0x204   :  { %1949 = vrsqrt.f32 %v250_v45  ;;  %vm409_vm6 = vweird.f32 %v250_v45 }
 0x209   :  { %v213_v17 = vpop.xlane.xlu1 %212 }
 0x20a   :  { %v233_v12 = vmul.f32 %v213_v17, %v2122_v20  ;;  %v1950_v21 = vpop.eup %1949 }
 0x20b   :  { %v404_v50 = vmul.f32 %v1950_v21, %v250_v45  ;;  %vm410_vm5 = vweird.f32 %v1950_v21 }
 0x20c   :  { %v251_v40 = vadd.f32 1e-05, %v233_v12  ;;  %vm411_vm7 = vmor %vm409_vm6, %vm410_vm5 }
 0x20d   :  { %v405_v5 = vmul.f32 %v1950_v21, %v404_v50 }
 0x20e   :  { %1951 = vrsqrt.f32 %v251_v40  ;;  %vm419_vm8 = vweird.f32 %v251_v40 }
 0x20f   :  { %v406_v52 = vmul.f32 0.5, %v405_v5 }
 0x210   :  { %v607_v11 = vpop.f32.mrf.mxu0  ;;  %v661_v26 = vpop.f32.mrf.mxu1 }
 0x211   :  { %v407_v59 = vsub.f32 1.5, %v406_v52  ;;  %v216_v27 = vpop.xlane.xlu2 %215  ;;  %v3007_v41 = vadd.f32 %v607_v11, %v2513_v22  ;;  %v3010_v63 = vadd.f32 %v661_v26, %v2529_v30 }
 0x212   :  { %v234_v9 = vmul.f32 %v216_v27, %v2122_v20  ;;  %v3020_v20 = vld [vmem:[%s3630_s1] ss:$0 sm:$0xff] }
 0x213   :  { %v408_v14 = vmul.f32 %v1950_v21, %v407_v59  ;;  %v1753_v37 = vmul.f32 -1.442695, %v3007_v41  ;;  %v1754_v2 = vmul.f32 -1.442695, %v3010_v63  ;;  %v468_v35 = vmul.f32 %v3020_v20, %v447_v8 }
 0x214   :  { %v1952_v49 = vpop.eup %1951  ;;  %v252_v31 = vadd.f32 1e-05, %v234_v9 }
 0x215   :  { %v414_v19 = vmul.f32 %v1952_v49, %v251_v40  ;;  %v412_v23 = vsel %vm411_vm7, %v1950_v21, %v408_v14  ;;  %1953 = vpow2.f32 %v1753_v37  ;;  %v489_v10 = vadd.f32 %v3033_v7, %v468_v35 }
 0x216   :  { %v448_v28 = vmul.f32 %v412_v23, %v2476_v54  ;;  %1955 = vrsqrt.f32 %v252_v31  ;;  %vm420_vm9 = vweird.f32 %v1952_v49  ;;  %vm429_vm12 = vweird.f32 %v252_v31 }
 0x217   :  { %v415_v62 = vmul.f32 %v1952_v49, %v414_v19  ;;  %1957 = vpow2.f32 %v1754_v2  ;;  %vm421_vm10 = vmor %vm419_vm8, %vm420_vm9 }
 0x218   :  { %v609_v51 = vpop.f32.mrf.mxu0  ;;  %v663_v15 = vpop.f32.mrf.mxu1  ;;  %v469_v42 = vmul.f32 %v3020_v20, %v448_v28 }
 0x219   :  { %v416_v24 = vmul.f32 0.5, %v415_v62  ;;  %v3025_v6 = vadd.f32 %v609_v51, %v2513_v22  ;;  %v3028_v54 = vadd.f32 %v663_v15, %v2529_v30 }
 0x21a   :  { %v490_v4 = vadd.f32 %v3033_v7, %v469_v42 }
 0x21b   :  { %v417_v46 = vsub.f32 1.5, %v416_v24  ;;  %v1954_v29 = vpop.eup %1953  ;;  %v1755_v48 = vmul.f32 -1.442695, %v3025_v6  ;;  %v1756_v56 = vmul.f32 -1.442695, %v3028_v54 }
 0x21c   :  { %v1956_v3 = vpop.eup %1955  ;;  %v3038_v32 = vadd.f32 1.0, %v1954_v29  ;;  %v500_v60 = vpack.c.bf16 %v490_v4, %v489_v10 }
 0x21d   :  { %v1958_v53 = vpop.eup %1957  ;;  %v418_v0 = vmul.f32 %v1952_v49, %v417_v46  ;;  %v424_v55 = vmul.f32 %v1956_v3, %v252_v31  ;;  %1959 = vpow2.f32 %v1755_v48  ;;  %vm430_vm11 = vweird.f32 %v1956_v3 }
 0x21e   :  { %1961 = vrcp.f32 %v3038_v32  ;;  %1730 = vmatmul.msk.bf16.gmra.mxu0 %vm47_vm0, %v500_v60  ;;  %1739 = vmatmul.msk.bf16.gmra.mxu1 %vm47_vm0, %v500_v60  ;;  %v3044_v13 = vadd.f32 1.0, %v1958_v53  ;;  %vm431_vm13 = vmor %vm429_vm12, %vm430_vm11  ;;  %v1026_v21 = vand.u32 2147483648, %v3038_v32  ;;  %vm1020_vm14 = vweird.f32 %v3038_v32 }
 0x21f   :  { %v425_v44 = vmul.f32 %v1956_v3, %v424_v55  ;;  %1963 = vpow2.f32 %v1756_v56  ;;  %v422_v39 = vsel %vm421_vm10, %v1952_v49, %v418_v0  ;;  %v1024_v59 = vand.u32 2147483647, %v3038_v32 }
 0x220   :  { %1965 = vrcp.f32 %v3044_v13  ;;  %v449_v36 = vmul.f32 %v422_v39, %v2509_v18  ;;  %v1041_v50 = vand.u32 2147483648, %v3044_v13  ;;  %v3072_v8 = vor.u32 1.1754944e-38, %v1026_v21 }
 0x221   :  { %v426_v1 = vmul.f32 0.5, %v425_v44  ;;  %v612_v57 = vpop.f32.mrf.mxu0  ;;  %v666_v45 = vpop.f32.mrf.mxu1  ;;  %vm1035_vm15 = vweird.f32 %v3044_v13  ;;  %v1039_v37 = vand.u32 2147483647, %v3044_v13  ;;  %vm1025_vm11 = vcmp.eq.f32.partialorder %v1024_v59, 8.507059e+37 }
 0x222   :  { %v3055_v17 = vadd.f32 %v612_v57, %v2513_v22  ;;  %v470_v26 = vmul.f32 %v3020_v20, %v449_v36  ;;  %v1042_v2 = vor.u32 1.1754944e-38, %v1041_v50 }
 0x223   :  { %v1960_v58 = vpop.eup %1959  ;;  %v427_v16 = vsub.f32 1.5, %v426_v1  ;;  %vm1040_vm12 = vcmp.eq.f32.partialorder %v1039_v37, 8.507059e+37 }
 0x224   :  { %v3047_v38 = vpop.eup %1961  ;;  %v3050_v47 = vadd.f32 1.0, %v1960_v58  ;;  %v1757_v5 = vmul.f32 -1.442695, %v3055_v17  ;;  %v491_v23 = vadd.f32 %v3033_v7, %v470_v26 }
 0x225   :  { %v428_v33 = vmul.f32 %v1956_v3, %v427_v16  ;;  %v1016_v43 = vmul.f32 %v3047_v38, %v3038_v32  ;;  %v1964_v12 = vpop.eup %1963  ;;  %vm1021_vm1 = vweird.f32 %v3047_v38 }
 0x226   :  { %1967 = vrcp.f32 %v3050_v47  ;;  %v3059_v34 = vpop.eup %1965  ;;  %v3062_v40 = vadd.f32 1.0, %v1964_v12  ;;  %v1056_v24 = vand.u32 2147483648, %v3050_v47  ;;  %vm3107_vm4 = vmor %vm1020_vm14, %vm1021_vm1  ;;  %vm1050_vm5 = vweird.f32 %v3050_v47 }
 0x227   :  { %v432_v18 = vsel %vm431_vm13, %v1956_v3, %v428_v33  ;;  %v1017_v52 = vsub.f32 1.0, %v1016_v43  ;;  %v1031_v11 = vmul.f32 %v3059_v34, %v3044_v13  ;;  %vm1036_vm2 = vweird.f32 %v3059_v34 }
 0x228   :  { %v450_v25 = vmul.f32 %v432_v18, %v2560_v61  ;;  %1969 = vrcp.f32 %v3062_v40  ;;  %v3076_v61 = vadd.f32 %v666_v45, %v2529_v30  ;;  %vm3116_vm6 = vmor %vm1035_vm15, %vm1036_vm2  ;;  %v1069_v32 = vand.u32 2147483647, %v3062_v40 }
 0x229   :  { %v1032_v27 = vsub.f32 1.0, %v1031_v11  ;;  %1971 = vpow2.f32 %v1757_v5  ;;  %v1018_v14 = vmul.f32 %v3047_v38, %v1017_v52  ;;  %v614_v19 = vpop.f32.mrf.mxu0  ;;  %v668_v31 = vpop.f32.mrf.mxu1  ;;  %v1071_v58 = vand.u32 2147483648, %v3062_v40 }
 0x22a   :  { %v471_v9 = vmul.f32 %v3020_v20, %v450_v25  ;;  %v1758_v35 = vmul.f32 -1.442695, %v3076_v61  ;;  %v1054_v20 = vand.u32 2147483647, %v3050_v47  ;;  %v3089_v51 = vadd.f32 %v614_v19, %v2513_v22 }
 0x22b   :  { %v1033_v28 = vmul.f32 %v3059_v34, %v1032_v27  ;;  %v3092_v15 = vadd.f32 %v668_v31, %v2529_v30  ;;  %v1019_v29 = vadd.f32 %v3047_v38, %v1018_v14  ;;  %v1057_v16 = vor.u32 1.1754944e-38, %v1056_v24 }
 0x22c   :  { %v1968_v49 = vpop.eup %1967  ;;  %1973 = vpow2.f32 %v1758_v35  ;;  %v492_v10 = vadd.f32 %v3033_v7, %v471_v9  ;;  %v1759_v3 = vmul.f32 -1.442695, %v3089_v51  ;;  %vm1055_vm9 = vcmp.eq.f32.partialorder %v1054_v20, 8.507059e+37 }
 0x22d   :  { %v1046_v62 = vmul.f32 %v1968_v49, %v3050_v47  ;;  %vm1051_vm3 = vweird.f32 %v1968_v49  ;;  %v1034_v56 = vadd.f32 %v3059_v34, %v1033_v28  ;;  %v1760_v0 = vmul.f32 -1.442695, %v3092_v15 }
 0x22e   :  { %v1970_v42 = vpop.eup %1969  ;;  %1975 = vpow2.f32 %v1759_v3  ;;  %v501_v44 = vpack.c.bf16 %v492_v10, %v491_v23  ;;  %vm1052_vm7 = vmor %vm1050_vm5, %vm1051_vm3  ;;  %v1023_v47 = vsel %vm3107_vm4, %v3047_v38, %v1019_v29  ;;  %vm1065_vm10 = vweird.f32 %v3062_v40 }
 0x22f   :  { %v1047_v46 = vsub.f32 1.0, %v1046_v62  ;;  %v1972_v4 = vpop.eup %1971  ;;  %v1061_v48 = vmul.f32 %v1970_v42, %v3062_v40  ;;  %vm1066_vm8 = vweird.f32 %v1970_v42  ;;  %v1038_v57 = vsel %vm3116_vm6, %v3059_v34, %v1034_v56 }
 0x230   :  { %v3100_v53 = vadd.f32 1.0, %v1972_v4  ;;  %1731 = vmatmul.msk.bf16.gmra.mxu0 %vm47_vm0, %v501_v44  ;;  %1740 = vmatmul.msk.bf16.gmra.mxu1 %vm47_vm0, %v501_v44  ;;  %vm1067_vm13 = vmor %vm1065_vm10, %vm1066_vm8  ;;  %vm1070_vm14 = vcmp.eq.f32.partialorder %v1069_v32, 8.507059e+37  ;;  %v1072_v21 = vor.u32 1.1754944e-38, %v1071_v58  ;;  %v1028_v5 = vsel %vm1025_vm11, %v3072_v8, %v1023_v47 }
 0x231   :  { %v1048_v60 = vmul.f32 %v1968_v49, %v1047_v46  ;;  %v1062_v55 = vsub.f32 1.0, %v1061_v48  ;;  %v617_v18 = vpop.f32.mrf.mxu0  ;;  %v671_v38 = vpop.f32.mrf.mxu1  ;;  %v1043_v34 = vsel %vm1040_vm12, %v1042_v2, %v1038_v57 }
 0x232   :  { %1977 = vrcp.f32 %v3100_v53  ;;  %v1974_v13 = vpop.eup %1973  ;;  %v3144_v59 = vadd.f32 %v617_v18, %v2513_v22  ;;  %v1388_v14 = vmul.f32 %v1043_v34, %v3010_v63  ;;  %v1084_v19 = vand.u32 2147483647, %v3100_v53 }
 0x233   :  { %v1049_v1 = vadd.f32 %v1968_v49, %v1048_v60  ;;  %v1063_v36 = vmul.f32 %v1970_v42, %v1062_v55  ;;  %1979 = vpow2.f32 %v1760_v0  ;;  %v3133_v12 = vadd.f32 1.0, %v1974_v13 }
 0x234   :  { %v1976_v50 = vpop.eup %1975  ;;  %v1761_v2 = vmul.f32 -1.442695, %v3144_v59  ;;  %v3157_v31 = vadd.f32 %v671_v38, %v2529_v30  ;;  %v1086_v63 = vand.u32 2147483648, %v3100_v53  ;;  %vm1080_vm15 = vweird.f32 %v3100_v53 }
 0x235   :  { %v1053_v45 = vsel %vm1052_vm7, %v1968_v49, %v1049_v1  ;;  %v1064_v43 = vadd.f32 %v1970_v42, %v1063_v36  ;;  %1981 = vrcp.f32 %v3133_v12  ;;  %v3141_v26 = vadd.f32 1.0, %v1976_v50 }
 0x236   :  { %v1058_v33 = vsel %vm1055_vm9, %v1057_v16, %v1053_v45  ;;  %v1387_v49 = vmul.f32 %v1028_v5, %v3007_v41  ;;  %v1762_v24 = vmul.f32 -1.442695, %v3157_v31  ;;  %vm3171_vm1 = vcmp.eq.f32.partialorder %v1084_v19, 8.507059e+37 }
 0x237   :  { %v1068_v25 = vsel %vm1067_vm13, %v1970_v42, %v1064_v43  ;;  %v1389_v40 = vmul.f32 %v1058_v33, %v3025_v6  ;;  %1983 = vrcp.f32 %v3141_v26  ;;  %v1087_v56 = vor.u32 1.1754944e-38, %v1086_v63 }
 0x238   :  { %v3138_v52 = vpop.eup %1977  ;;  %v1073_v11 = vsel %vm1070_vm14, %v1072_v21, %v1068_v25  ;;  %v1116_v60 = vand.u32 2147483648, %v3141_v26  ;;  %v1099_v39 = vand.u32 2147483647, %v3133_v12  ;;  %v1101_v1 = vand.u32 2147483648, %v3133_v12 }
 0x239   :  { %v1980_v27 = vpop.eup %1979  ;;  %v1390_v9 = vmul.f32 %v1073_v11, %v3028_v54  ;;  %v1076_v8 = vmul.f32 %v3138_v52, %v3100_v53  ;;  %v1417_v54 = vpack.c.bf16 %v1389_v40, %v1387_v49  ;;  %v619_v35 = vpop.f32.mrf.mxu0  ;;  %vm1081_vm2 = vweird.f32 %v3138_v52 }
 0x23a   :  { %v3152_v6 = vadd.f32 1.0, %v1980_v27  ;;  %v673_v20 = vpop.f32.mrf.mxu1  ;;  %v3168_v42 = vadd.f32 %v619_v35, %v2513_v22  ;;  %vm3189_vm3 = vmor %vm1080_vm15, %vm1081_vm2  ;;  %vm1110_vm4 = vweird.f32 %v3141_v26  ;;  %v1114_v16 = vand.u32 2147483647, %v3141_v26 }
 0x23b   :  { %v1077_v37 = vsub.f32 1.0, %v1076_v8  ;;  %v1418_v23 = vpack.c.bf16 %v1390_v9, %v1388_v14  ;;  %v3159_v28 = vpop.eup %1981  ;;  %1584 = vmatmul.bf16.gmra.mxu2 %v1417_v54  ;;  %v3176_v29 = vadd.f32 %v673_v20, %v2529_v30  ;;  %v1117_v53 = vor.u32 1.1754944e-38, %v1116_v60 }
 0x23c   :  { %1985 = vrcp.f32 %v3152_v6  ;;  %v1091_v62 = vmul.f32 %v3159_v28, %v3133_v12  ;;  %v1763_v0 = vmul.f32 -1.442695, %v3168_v42  ;;  %v1131_v33 = vand.u32 2147483648, %v3152_v6 }
 0x23d   :  { %v1078_v41 = vmul.f32 %v3138_v52, %v1077_v37  ;;  %1638 = vmatmul.bf16.gmra.mxu3 %v1418_v23  ;;  %1987 = vpow2.f32 %v1761_v2  ;;  %v1984_v46 = vpop.eup %1983  ;;  %v1764_v7 = vmul.f32 -1.442695, %v3176_v29  ;;  %vm1096_vm6 = vweird.f32 %v3159_v28 }
 0x23e   :  { %v1092_v4 = vsub.f32 1.0, %v1091_v62  ;;  %v1106_v3 = vmul.f32 %v1984_v46, %v3141_v26  ;;  %1989 = vpow2.f32 %v1762_v24  ;;  %vm1111_vm5 = vweird.f32 %v1984_v46 }
 0x23f   :  { %v1079_v48 = vadd.f32 %v3138_v52, %v1078_v41  ;;  %1991 = vpow2.f32 %v1763_v0  ;;  %v1129_v50 = vand.u32 2147483647, %v3152_v6  ;;  %vm1112_vm7 = vmor %vm1110_vm4, %vm1111_vm5  ;;  %vm1095_vm9 = vweird.f32 %v3133_v12 }
 0x240   :  { %v1093_v44 = vmul.f32 %v3159_v28, %v1092_v4  ;;  %v1107_v32 = vsub.f32 1.0, %v1106_v3  ;;  %1993 = vpow2.f32 %v1764_v7  ;;  %vm1115_vm10 = vcmp.eq.f32.partialorder %v1114_v16, 8.507059e+37  ;;  %vm3213_vm11 = vmor %vm1095_vm9, %vm1096_vm6 }
 0x241   :  { %v1083_v47 = vsel %vm3189_vm3, %v3138_v52, %v1079_v48  ;;  %vm1125_vm12 = vweird.f32 %v3152_v6  ;;  %v1132_v26 = vor.u32 1.1754944e-38, %v1131_v33  ;;  %vm1100_vm14 = vcmp.eq.f32.partialorder %v1099_v39, 8.507059e+37 }
 0x242   :  { %v1986_v55 = vpop.eup %1985  ;;  %v1108_v57 = vmul.f32 %v1984_v46, %v1107_v32  ;;  %v1094_v18 = vadd.f32 %v3159_v28, %v1093_v44  ;;  %v1088_v5 = vsel %vm3171_vm1, %v1087_v56, %v1083_v47  ;;  %v1102_v37 = vor.u32 1.1754944e-38, %v1101_v1 }
 0x243   :  { %v1121_v36 = vmul.f32 %v1986_v55, %v3152_v6  ;;  %v1988_v13 = vpop.eup %1987  ;;  %vm1126_vm8 = vweird.f32 %v1986_v55  ;;  %v1391_v49 = vmul.f32 %v1088_v5, %v3055_v17  ;;  %vm1130_vm15 = vcmp.eq.f32.partialorder %v1129_v50, 8.507059e+37 }
 0x244   :  { %v3200_v43 = vadd.f32 1.0, %v1988_v13  ;;  %v1990_v21 = vpop.eup %1989  ;;  %v1109_v38 = vadd.f32 %v1984_v46, %v1108_v57  ;;  %v1098_v12 = vsel %vm3213_vm11, %v3159_v28, %v1094_v18  ;;  %vm1127_vm13 = vmor %vm1125_vm12, %vm1126_vm8 }
 0x245   :  { %v1122_v45 = vsub.f32 1.0, %v1121_v36  ;;  %v3211_v52 = vadd.f32 1.0, %v1990_v21  ;;  %v1992_v40 = vpop.eup %1991  ;;  %v1103_v41 = vsel %vm1100_vm14, %v1102_v37, %v1098_v12 }
 0x246   :  { %1995 = vrcp.f32 %v3200_v43  ;;  %v1113_v25 = vsel %vm1112_vm7, %v1984_v46, %v1109_v38  ;;  %v1994_v8 = vpop.eup %1993  ;;  %v3225_v6 = vadd.f32 1.0, %v1992_v40  ;;  %v1146_v28 = vand.u32 2147483648, %v3200_v43  ;;  %v3242_v46 = vld [vmem:[%s3635_s6] ss:$0 sm:$0xff] }
 0x247   :  { %v1123_v34 = vmul.f32 %v1986_v55, %v1122_v45  ;;  %v1118_v27 = vsel %vm1115_vm10, %v1117_v53, %v1113_v25  ;;  %1997 = vrcp.f32 %v3211_v52  ;;  %v3227_v54 = vadd.f32 1.0, %v1994_v8  ;;  %v622_v62 = vpop.f32.mrf.mxu0  ;;  %v676_v35 = vpop.f32.mrf.mxu1 }
 0x248   :  { %v1393_v14 = vmul.f32 %v1118_v27, %v3089_v51  ;;  %v1161_v63 = vand.u32 2147483648, %v3211_v52  ;;  %1999 = vrcp.f32 %v3225_v6  ;;  %v1144_v24 = vand.u32 2147483647, %v3200_v43  ;;  %v1624_v44 = vpop.f32.mrf.mxu3 }
 0x249   :  { %v1124_v9 = vadd.f32 %v1986_v55, %v1123_v34  ;;  %2001 = vrcp.f32 %v3227_v54  ;;  %v1392_v4 = vmul.f32 %v1103_v41, %v3076_v61  ;;  %v1159_v3 = vand.u32 2147483647, %v3211_v52 }
 0x24a   :  { %v1419_v17 = vpack.c.bf16 %v1393_v14, %v1391_v49  ;;  %v3249_v56 = vadd.f32 %v622_v62, %v2513_v22  ;;  %vm1140_vm1 = vweird.f32 %v3200_v43  ;;  %vm1155_vm2 = vweird.f32 %v3211_v52 }
 0x24b   :  { %v1128_v2 = vsel %vm1127_vm13, %v1986_v55, %v1124_v9  ;;  %v1162_v7 = vor.u32 1.1754944e-38, %v1161_v63  ;;  %v1570_v55 = vpop.f32.mrf.mxu2  ;;  %vm3258_vm4 = vcmp.eq.f32.partialorder %v1144_v24, 8.507059e+37  ;;  %v3263_v32 = vadd.f32 %v676_v35, %v2529_v30 }
 0x24c   :  { %v1133_v19 = vsel %vm1130_vm15, %v1132_v26, %v1128_v2  ;;  %v3229_v23 = vpop.eup %1995  ;;  %1589 = vmatmul.bf16.gmra.mxu2 %v1419_v17  ;;  %v1765_v61 = vmul.f32 -1.442695, %v3249_v56  ;;  %v1571_v58 = vadd.f32 %v3242_v46, %v1570_v55  ;;  %vm3266_vm5 = vcmp.eq.f32.partialorder %v1159_v3, 8.507059e+37 }
 0x24d   :  { %v1136_v51 = vmul.f32 %v3229_v23, %v3200_v43  ;;  %v1394_v20 = vmul.f32 %v1133_v19, %v3092_v15  ;;  %v3244_v10 = vpop.eup %1997  ;;  %v1147_v15 = vor.u32 1.1754944e-38, %v1146_v28  ;;  %vm1141_vm3 = vweird.f32 %v3229_v23 }
 0x24e   :  { %v1151_v60 = vmul.f32 %v3244_v10, %v3211_v52  ;;  %v2000_v36 = vpop.eup %1999  ;;  %vm1170_vm6 = vweird.f32 %v3225_v6  ;;  %v1174_v47 = vand.u32 2147483647, %v3225_v6  ;;  %v1176_v57 = vand.u32 2147483648, %v3225_v6  ;;  %vm3286_vm9 = vmor %vm1140_vm1, %vm1141_vm3 }
 0x24f   :  { %v1137_v48 = vsub.f32 1.0, %v1136_v51  ;;  %v1420_v16 = vpack.c.bf16 %v1394_v20, %v1392_v4  ;;  %2003 = vpow2.f32 %v1765_v61  ;;  %v2002_v53 = vpop.eup %2001  ;;  %v1166_v21 = vmul.f32 %v2000_v36, %v3225_v6  ;;  %v624_v5 = vpop.f32.mrf.mxu0 }
 0x250   :  { %v1152_v1 = vsub.f32 1.0, %v1151_v60  ;;  %v1766_v18 = vmul.f32 -1.442695, %v3263_v32  ;;  %vm1156_vm7 = vweird.f32 %v3244_v10  ;;  %v1181_v38 = vmul.f32 %v2002_v53, %v3227_v54  ;;  %v678_v34 = vpop.f32.mrf.mxu1  ;;  %v1626_v41 = vpop.f32.mrf.mxu3 }
 0x251   :  { %v1138_v0 = vmul.f32 %v3229_v23, %v1137_v48  ;;  %1643 = vmatmul.bf16.gmra.mxu3 %v1420_v16  ;;  %vm1185_vm8 = vweird.f32 %v3227_v54  ;;  %v1625_v50 = vadd.f32 %v1624_v44, %v1571_v58  ;;  %v1167_v40 = vsub.f32 1.0, %v1166_v21  ;;  %vm3308_vm10 = vmor %vm1155_vm2, %vm1156_vm7 }
 0x252   :  { %v1153_v33 = vmul.f32 %v3244_v10, %v1152_v1  ;;  %v1189_v11 = vand.u32 2147483647, %v3227_v54  ;;  %2005 = vpow2.f32 %v1766_v18  ;;  %v1182_v9 = vsub.f32 1.0, %v1181_v38 }
 0x253   :  { %v1139_v45 = vadd.f32 %v3229_v23, %v1138_v0  ;;  %v1191_v26 = vand.u32 2147483648, %v3227_v54  ;;  %1669 = vst.msk [vmem:[%s3636_s7] sm:$0xff] %vm47_vm0, %v1625_v50  ;;  %v3296_v8 = vadd.f32 %v624_v5, %v2513_v22  ;;  %v3299_v49 = vadd.f32 %v678_v34, %v2529_v30  ;;  %v1572_v52 = vpop.f32.mrf.mxu2 }
 0x254   :  { %v1154_v25 = vadd.f32 %v3244_v10, %v1153_v33  ;;  %v1168_v14 = vmul.f32 %v2000_v36, %v1167_v40  ;;  %vm1171_vm11 = vweird.f32 %v2000_v36  ;;  %vm3312_vm12 = vcmp.eq.f32.partialorder %v1174_v47, 8.507059e+37 }
 0x255   :  { %v1143_v43 = vsel %vm3286_vm9, %v3229_v23, %v1139_v45  ;;  %v2004_v2 = vpop.eup %2003  ;;  %v1183_v17 = vmul.f32 %v2002_v53, %v1182_v9  ;;  %vm1186_vm13 = vweird.f32 %v2002_v53  ;;  %v1767_v23 = vmul.f32 -1.442695, %v3296_v8  ;;  %vm1172_vm14 = vmor %vm1170_vm6, %vm1171_vm11 }
 0x256   :  { %v1158_v19 = vsel %vm3308_vm10, %v3244_v10, %v1154_v25  ;;  %v1169_v28 = vadd.f32 %v2000_v36, %v1168_v14  ;;  %v1177_v51 = vor.u32 1.1754944e-38, %v1176_v57  ;;  %v3320_v63 = vadd.f32 1.0, %v2004_v2  ;;  %vm1187_vm15 = vmor %vm1185_vm8, %vm1186_vm13 }
 0x257   :  { %v1768_v62 = vmul.f32 -1.442695, %v3299_v49  ;;  %v1148_v35 = vsel %vm3258_vm4, %v1147_v15, %v1143_v43  ;;  %v1184_v20 = vadd.f32 %v2002_v53, %v1183_v17  ;;  %v1192_v24 = vor.u32 1.1754944e-38, %v1191_v26 }
 0x258   :  { %2007 = vpow2.f32 %v1767_v23  ;;  %v2006_v10 = vpop.eup %2005  ;;  %v1163_v4 = vsel %vm3266_vm5, %v1162_v7, %v1158_v19  ;;  %v1173_v48 = vsel %vm1172_vm14, %v2000_v36, %v1169_v28  ;;  %v1573_v3 = vadd.f32 %v3242_v46, %v1572_v52  ;;  %v1629_v16 = vpop.f32.mrf.mxu3 }
 0x259   :  { %2009 = vrcp.f32 %v3320_v63  ;;  %v1178_v6 = vsel %vm3312_vm12, %v1177_v51, %v1173_v48  ;;  %v1188_v15 = vsel %vm1187_vm15, %v2002_v53, %v1184_v20  ;;  %vm1190_vm1 = vcmp.eq.f32.partialorder %v1189_v11, 8.507059e+37 }
 0x25a   :  { %v3336_v60 = vadd.f32 1.0, %v2006_v10  ;;  %v1395_v0 = vmul.f32 %v1148_v35, %v3144_v59  ;;  %v1397_v7 = vmul.f32 %v1178_v6, %v3168_v42  ;;  %v1193_v61 = vsel %vm1190_vm1, %v1192_v24, %v1188_v15 }
 0x25b   :  { %2011 = vpow2.f32 %v1768_v62  ;;  %v1396_v54 = vmul.f32 %v1163_v4, %v3157_v31  ;;  %v1398_v55 = vmul.f32 %v1193_v61, %v3176_v29  ;;  %v1627_v44 = vadd.f32 %v1626_v41, %v1573_v3  ;;  %v1575_v58 = vpop.f32.mrf.mxu2 }
 0x25c   :  { %2013 = vrcp.f32 %v3336_v60  ;;  %v1421_v39 = vpack.c.bf16 %v1397_v7, %v1395_v0  ;;  %v1576_v59 = vadd.f32 %v3242_v46, %v1575_v58  ;;  %v1204_v38 = vand.u32 2147483647, %v3320_v63 }
 0x25d   :  { %v1422_v36 = vpack.c.bf16 %v1398_v55, %v1396_v54  ;;  %1670 = vst.msk [vmem:[%s3636_s7 + $0x8] sm:$0xff] %vm47_vm0, %v1627_v44  ;;  %v1206_v50 = vand.u32 2147483648, %v3320_v63  ;;  %vm1200_vm3 = vweird.f32 %v3320_v63  ;;  %v1219_v19 = vand.u32 2147483647, %v3336_v60 }
 0x25e   :  { %v2008_v1 = vpop.eup %2007  ;;  %1594 = vmatmul.bf16.gmra.mxu2 %v1421_v39  ;;  %v1630_v45 = vadd.f32 %v1629_v16, %v1576_v59  ;;  %vm3374_vm5 = vcmp.eq.f32.partialorder %v1204_v38, 8.507059e+37  ;;  %v1221_v28 = vand.u32 2147483648, %v3336_v60  ;;  %vm1215_vm8 = vweird.f32 %v3336_v60 }
 0x25f   :  { %v2010_v13 = vpop.eup %2009  ;;  %v3343_v47 = vadd.f32 1.0, %v2008_v1  ;;  %v1207_v2 = vor.u32 1.1754944e-38, %v1206_v50  ;;  %vm1220_vm13 = vcmp.eq.f32.partialorder %v1219_v19, 8.507059e+37 }
 0x260   :  { %v1196_v31 = vmul.f32 %v2010_v13, %v3320_v63  ;;  %1671 = vst.msk [vmem:[%s3636_s7 + $0x10] sm:$0xff] %vm47_vm0, %v1630_v45  ;;  %v1631_v34 = vpop.f32.mrf.mxu3  ;;  %vm1201_vm2 = vweird.f32 %v2010_v13  ;;  %v1222_v7 = vor.u32 1.1754944e-38, %v1221_v28 }
 0x261   :  { %v2012_v42 = vpop.eup %2011  ;;  %2015 = vrcp.f32 %v3343_v47  ;;  %1648 = vmatmul.bf16.gmra.mxu3 %v1422_v36  ;;  %v1236_v26 = vand.u32 2147483648, %v3343_v47  ;;  %vm3370_vm4 = vmor %vm1200_vm3, %vm1201_vm2  ;;  %v1234_v63 = vand.u32 2147483647, %v3343_v47  ;;  %vm1230_vm9 = vweird.f32 %v3343_v47 }
 0x262   :  { %v3352_v29 = vpop.eup %2013  ;;  %v1197_v57 = vsub.f32 1.0, %v1196_v31  ;;  %v3354_v53 = vadd.f32 1.0, %v2012_v42 }
 0x263   :  { %v1211_v33 = vmul.f32 %v3352_v29, %v3336_v60  ;;  %v1577_v5 = vpop.f32.mrf.mxu2  ;;  %vm1216_vm6 = vweird.f32 %v3352_v29  ;;  %v1237_v62 = vor.u32 1.1754944e-38, %v1236_v26  ;;  %vm1235_vm14 = vcmp.eq.f32.partialorder %v1234_v63, 8.507059e+37 }
 0x264   :  { %v1198_v21 = vmul.f32 %v2010_v13, %v1197_v57  ;;  %2017 = vrcp.f32 %v3354_v53  ;;  %v1578_v27 = vadd.f32 %v3242_v46, %v1577_v5  ;;  %vm3394_vm10 = vmor %vm1215_vm8, %vm1216_vm6  ;;  %v1249_v4 = vand.u32 2147483647, %v3354_v53 }
 0x265   :  { %v1212_v18 = vsub.f32 1.0, %v1211_v33  ;;  %v1251_v48 = vand.u32 2147483648, %v3354_v53  ;;  %vm1245_vm15 = vweird.f32 %v3354_v53 }
 0x266   :  { %v1199_v40 = vadd.f32 %v2010_v13, %v1198_v21  ;;  %v1632_v43 = vadd.f32 %v1631_v34, %v1578_v27  ;;  %vm1250_vm2 = vcmp.eq.f32.partialorder %v1249_v4, 8.507059e+37 }
 0x267   :  { %v2016_v25 = vpop.eup %2015  ;;  %v1213_v11 = vmul.f32 %v3352_v29, %v1212_v18  ;;  %v1252_v16 = vor.u32 1.1754944e-38, %v1251_v48 }
 0x268   :  { %v1226_v9 = vmul.f32 %v2016_v25, %v3343_v47  ;;  %v1203_v23 = vsel %vm3370_vm4, %v2010_v13, %v1199_v40  ;;  %1672 = vst.msk [vmem:[%s3636_s7 + $0x18] sm:$0xff] %vm47_vm0, %v1632_v43  ;;  %vm1231_vm7 = vweird.f32 %v2016_v25  ;;  %v1634_v6 = vpop.f32.mrf.mxu3 }
 0x269   :  { %v1214_v52 = vadd.f32 %v3352_v29, %v1213_v11  ;;  %v1208_v20 = vsel %vm3374_vm5, %v1207_v2, %v1203_v23  ;;  %vm1232_vm11 = vmor %vm1230_vm9, %vm1231_vm7 }
 0x26a   :  { %v2018_v12 = vpop.eup %2017  ;;  %v1227_v17 = vsub.f32 1.0, %v1226_v9  ;;  %v1399_v39 = vmul.f32 %v1208_v20, %v3249_v56 }
 0x26b   :  { %v1241_v41 = vmul.f32 %v2018_v12, %v3354_v53  ;;  %v1580_v3 = vpop.f32.mrf.mxu2  ;;  %v1218_v15 = vsel %vm3394_vm10, %v3352_v29, %v1214_v52  ;;  %vm1246_vm12 = vweird.f32 %v2018_v12 }
 0x26c   :  { %v1228_v51 = vmul.f32 %v2016_v25, %v1227_v17  ;;  %v1581_v0 = vadd.f32 %v3242_v46, %v1580_v3  ;;  %v1223_v1 = vsel %vm1220_vm13, %v1222_v7, %v1218_v15  ;;  %vm1247_vm1 = vmor %vm1245_vm15, %vm1246_vm12 }
 0x26d   :  { %v1242_v35 = vsub.f32 1.0, %v1241_v41  ;;  %v1400_v59 = vmul.f32 %v1223_v1, %v3263_v32 }
 0x26e   :  { %v1229_v10 = vadd.f32 %v2016_v25, %v1228_v51  ;;  %v1635_v44 = vadd.f32 %v1634_v6, %v1581_v0 }
 0x26f   :  { %v1243_v60 = vmul.f32 %v2018_v12, %v1242_v35 }
 0x270   :  { %v1233_v61 = vsel %vm1232_vm11, %v2016_v25, %v1229_v10  ;;  %1673 = vst.msk [vmem:[%s3636_s7 + $0x20] sm:$0xff] %vm47_vm0, %v1635_v44  ;;  %v1636_v29 = vpop.f32.mrf.mxu3 }
 0x271   :  { %v1238_v54 = vsel %vm1235_vm14, %v1237_v62, %v1233_v61  ;;  %v1244_v55 = vadd.f32 %v2018_v12, %v1243_v60 }
 0x272   :  { %v1401_v58 = vmul.f32 %v1238_v54, %v3296_v8 }
 0x273   :  { %v1248_v36 = vsel %vm1247_vm1, %v2018_v12, %v1244_v55  ;;  %v1582_v42 = vpop.f32.mrf.mxu2 }
 0x274   :  { %v1253_v13 = vsel %vm1250_vm2, %v1252_v16, %v1248_v36  ;;  %v1423_v47 = vpack.c.bf16 %v1401_v58, %v1399_v39  ;;  %v1583_v56 = vadd.f32 %v3242_v46, %v1582_v42 }
 0x275   :  { %v1402_v31 = vmul.f32 %v1253_v13, %v3299_v49 }
 0x276   :  { %1599 = vmatmul.bf16.gmra.mxu2 %v1423_v47  ;;  %v1637_v57 = vadd.f32 %v1636_v29, %v1583_v56 }
 0x277   :  { %v1424_v8 = vpack.c.bf16 %v1402_v31, %v1400_v59 }
 0x278   :  { %1674 = vst.msk [vmem:[%s3636_s7 + $0x28] sm:$0xff] %vm47_vm0, %v1637_v57 }
 0x279   :  { %1653 = vmatmul.bf16.gmra.mxu3 %v1424_v8 }
 0x29b   :  { %v627_v53 = vpop.f32.mrf.mxu0  ;;  %v681_v45 = vpop.f32.mrf.mxu1 }
 0x29c   :  { %v3419_v33 = vadd.f32 %v627_v53, %v2513_v22  ;;  %v3422_v32 = vadd.f32 %v681_v45, %v2529_v30 }
 0x29e   :  { %v1769_v49 = vmul.f32 -1.442695, %v3419_v33  ;;  %v1770_v21 = vmul.f32 -1.442695, %v3422_v32 }
 0x2a0   :  { %2019 = vpow2.f32 %v1769_v49 }
 0x2a1   :  { %2021 = vpow2.f32 %v1770_v21 }
 0x2a3   :  { %v629_v18 = vpop.f32.mrf.mxu0  ;;  %v683_v38 = vpop.f32.mrf.mxu1 }
 0x2a4   :  { %v3427_v50 = vadd.f32 %v629_v18, %v2513_v22  ;;  %v3430_v5 = vadd.f32 %v683_v38, %v2529_v30 }
 0x2a6   :  { %v2020_v34 = vpop.eup %2019  ;;  %v1771_v25 = vmul.f32 -1.442695, %v3427_v50  ;;  %v1772_v27 = vmul.f32 -1.442695, %v3430_v5 }
 0x2a7   :  { %v2022_v40 = vpop.eup %2021  ;;  %v827_v11 = vadd.f32 1.0, %v2020_v34 }
 0x2a8   :  { %v3434_v9 = vadd.f32 1.0, %v2022_v40  ;;  %2023 = vpow2.f32 %v1771_v25 }
 0x2a9   :  { %2025 = vrcp.f32 %v827_v11  ;;  %v1264_v63 = vand.u32 2147483647, %v827_v11  ;;  %v1266_v62 = vand.u32 2147483648, %v827_v11  ;;  %vm1260_vm3 = vweird.f32 %v827_v11 }
 0x2aa   :  { %2027 = vrcp.f32 %v3434_v9  ;;  %v1279_v48 = vand.u32 2147483647, %v3434_v9  ;;  %v1281_v3 = vand.u32 2147483648, %v3434_v9  ;;  %vm1275_vm5 = vweird.f32 %v3434_v9 }
 0x2ab   :  { %2029 = vpow2.f32 %v1772_v27  ;;  %vm3461_vm4 = vcmp.eq.f32.partialorder %v1264_v63, 8.507059e+37  ;;  %v1267_v0 = vor.u32 1.1754944e-38, %v1266_v62 }
 0x2ad   :  { %v632_v19 = vpop.f32.mrf.mxu0  ;;  %v686_v17 = vpop.f32.mrf.mxu1 }
 0x2ae   :  { %v2024_v26 = vpop.eup %2023  ;;  %v3450_v28 = vadd.f32 %v632_v19, %v2513_v22  ;;  %v3453_v51 = vadd.f32 %v686_v17, %v2529_v30 }
 0x2af   :  { %v3437_v43 = vpop.eup %2025  ;;  %v3439_v12 = vadd.f32 1.0, %v2024_v26 }
 0x2b0   :  { %v3441_v14 = vpop.eup %2027  ;;  %v1256_v37 = vmul.f32 %v3437_v43, %v827_v11  ;;  %v1773_v24 = vmul.f32 -1.442695, %v3450_v28  ;;  %v1774_v10 = vmul.f32 -1.442695, %v3453_v51  ;;  %vm1261_vm6 = vweird.f32 %v3437_v43 }
 0x2b1   :  { %v2030_v2 = vpop.eup %2029  ;;  %2031 = vrcp.f32 %v3439_v12  ;;  %v1271_v52 = vmul.f32 %v3441_v14, %v3434_v9  ;;  %v1296_v60 = vand.u32 2147483648, %v3439_v12  ;;  %vm1276_vm7 = vweird.f32 %v3441_v14  ;;  %vm3485_vm10 = vmor %vm1260_vm3, %vm1261_vm6 }
 0x2b2   :  { %v1257_v23 = vsub.f32 1.0, %v1256_v37  ;;  %v3447_v41 = vadd.f32 1.0, %v2030_v2  ;;  %vm1290_vm8 = vweird.f32 %v3439_v12  ;;  %v1294_v58 = vand.u32 2147483647, %v3439_v12  ;;  %vm3509_vm15 = vmor %vm1275_vm5, %vm1276_vm7 }
 0x2b3   :  { %v1272_v20 = vsub.f32 1.0, %v1271_v52  ;;  %v1297_v47 = vor.u32 1.1754944e-38, %v1296_v60  ;;  %v1282_v2 = vor.u32 1.1754944e-38, %v1281_v3  ;;  %vm1280_vm3 = vcmp.eq.f32.partialorder %v1279_v48, 8.507059e+37 }
 0x2b4   :  { %2033 = vrcp.f32 %v3447_v41  ;;  %v1258_v35 = vmul.f32 %v3437_v43, %v1257_v23  ;;  %v1309_v42 = vand.u32 2147483647, %v3447_v41  ;;  %v1311_v56 = vand.u32 2147483648, %v3447_v41 }
 0x2b5   :  { %2035 = vpow2.f32 %v1773_v24  ;;  %v634_v7 = vpop.f32.mrf.mxu0  ;;  %v688_v61 = vpop.f32.mrf.mxu1  ;;  %v1273_v44 = vmul.f32 %v3441_v14, %v1272_v20  ;;  %vm1295_vm13 = vcmp.eq.f32.partialorder %v1294_v58, 8.507059e+37  ;;  %vm1305_vm14 = vweird.f32 %v3447_v41 }
 0x2b6   :  { %2037 = vpow2.f32 %v1774_v10  ;;  %v1259_v55 = vadd.f32 %v3437_v43, %v1258_v35  ;;  %v3473_v1 = vadd.f32 %v634_v7, %v2513_v22  ;;  %v3479_v36 = vadd.f32 %v688_v61, %v2529_v30 }
 0x2b7   :  { %v2032_v4 = vpop.eup %2031  ;;  %v1274_v57 = vadd.f32 %v3441_v14, %v1273_v44  ;;  %vm1310_vm2 = vcmp.eq.f32.partialorder %v1309_v42, 8.507059e+37 }
 0x2b8   :  { %v1286_v15 = vmul.f32 %v2032_v4, %v3439_v12  ;;  %vm1291_vm9 = vweird.f32 %v2032_v4  ;;  %v1775_v59 = vmul.f32 -1.442695, %v3473_v1  ;;  %v1776_v30 = vmul.f32 -1.442695, %v3479_v36 }
 0x2b9   :  { %v1263_v29 = vsel %vm3485_vm10, %v3437_v43, %v1259_v55  ;;  %vm1292_vm11 = vmor %vm1290_vm8, %vm1291_vm9  ;;  %v1278_v27 = vsel %vm3509_vm15, %v3441_v14, %v1274_v57  ;;  %v1312_v43 = vor.u32 1.1754944e-38, %v1311_v56 }
 0x2ba   :  { %v2034_v54 = vpop.eup %2033  ;;  %v1287_v39 = vsub.f32 1.0, %v1286_v15  ;;  %2039 = vpow2.f32 %v1775_v59  ;;  %v1268_v34 = vsel %vm3461_vm4, %v1267_v0, %v1263_v29 }
 0x2bb   :  { %v1301_v16 = vmul.f32 %v2034_v54, %v3447_v41  ;;  %v2036_v8 = vpop.eup %2035  ;;  %vm1306_vm12 = vweird.f32 %v2034_v54  ;;  %2041 = vpow2.f32 %v1776_v30  ;;  %v1403_v23 = vmul.f32 %v1268_v34, %v3419_v33 }
 0x2bc   :  { %v1288_v13 = vmul.f32 %v2032_v4, %v1287_v39  ;;  %v2038_v45 = vpop.eup %2037  ;;  %v3498_v21 = vadd.f32 1.0, %v2036_v8  ;;  %vm1307_vm1 = vmor %vm1305_vm14, %vm1306_vm12 }
 0x2bd   :  { %v1302_v31 = vsub.f32 1.0, %v1301_v16  ;;  %v3501_v38 = vadd.f32 1.0, %v2038_v45 }
 0x2be   :  { %v1289_v53 = vadd.f32 %v2032_v4, %v1288_v13  ;;  %2043 = vrcp.f32 %v3498_v21  ;;  %v1585_v12 = vpop.f32.mrf.mxu2  ;;  %vm1320_vm4 = vweird.f32 %v3498_v21 }
 0x2bf   :  { %v1303_v49 = vmul.f32 %v2034_v54, %v1302_v31  ;;  %2045 = vrcp.f32 %v3501_v38  ;;  %v1586_v14 = vadd.f32 %v3242_v46, %v1585_v12  ;;  %vm1335_vm6 = vweird.f32 %v3501_v38 }
 0x2c0   :  { %v1293_v18 = vsel %vm1292_vm11, %v2032_v4, %v1289_v53  ;;  %v1639_v37 = vpop.f32.mrf.mxu3  ;;  %v2040_v17 = vpop.eup %2039  ;;  %v1339_v22 = vand.u32 2147483647, %v3501_v38  ;;  %v1341_v31 = vand.u32 2147483648, %v3501_v38 }
 0x2c1   :  { %v1298_v40 = vsel %vm1295_vm13, %v1297_v47, %v1293_v18  ;;  %v1304_v11 = vadd.f32 %v2034_v54, %v1303_v49  ;;  %v2042_v41 = vpop.eup %2041  ;;  %v3523_v63 = vadd.f32 1.0, %v2040_v17  ;;  %v1640_v20 = vadd.f32 %v1639_v37, %v1586_v14 }
 0x2c2   :  { %v1405_v26 = vmul.f32 %v1298_v40, %v3427_v50  ;;  %v1283_v50 = vsel %vm1280_vm3, %v1282_v2, %v1278_v27  ;;  %v3526_v35 = vadd.f32 1.0, %v2042_v41  ;;  %vm1340_vm13 = vcmp.eq.f32.partialorder %v1339_v22, 8.507059e+37 }
 0x2c3   :  { %v1308_v19 = vsel %vm1307_vm1, %v2034_v54, %v1304_v11  ;;  %2047 = vrcp.f32 %v3523_v63  ;;  %v1404_v9 = vmul.f32 %v1283_v50, %v3422_v32  ;;  %1675 = vst.msk [vmem:[%s3636_s7 + $0x30] sm:$0xff] %vm47_vm0, %v1640_v20  ;;  %v1324_v32 = vand.u32 2147483647, %v3498_v21 }
 0x2c4   :  { %v1313_v52 = vsel %vm1310_vm2, %v1312_v43, %v1308_v19  ;;  %v1425_v24 = vpack.c.bf16 %v1405_v26, %v1403_v23  ;;  %v2044_v10 = vpop.eup %2043  ;;  %2049 = vrcp.f32 %v3526_v35  ;;  %v1326_v54 = vand.u32 2147483648, %v3498_v21 }
 0x2c5   :  { %v1406_v62 = vmul.f32 %v1313_v52, %v3430_v5  ;;  %v2046_v33 = vpop.eup %2045  ;;  %v1316_v4 = vmul.f32 %v2044_v10, %v3498_v21  ;;  %vm1321_vm5 = vweird.f32 %v2044_v10  ;;  %vm3548_vm8 = vcmp.eq.f32.partialorder %v1324_v32, 8.507059e+37 }
 0x2c6   :  { %1604 = vmatmul.bf16.gmra.mxu2 %v1425_v24  ;;  %v1331_v5 = vmul.f32 %v2046_v33, %v3501_v38  ;;  %v1587_v3 = vpop.f32.mrf.mxu2  ;;  %vm1336_vm7 = vweird.f32 %v2046_v33  ;;  %vm3554_vm9 = vmor %vm1320_vm4, %vm1321_vm5  ;;  %v1327_v30 = vor.u32 1.1754944e-38, %v1326_v54  ;;  %v1354_v8 = vand.u32 2147483647, %v3523_v63 }
 0x2c7   :  { %v1317_v48 = vsub.f32 1.0, %v1316_v4  ;;  %v1426_v6 = vpack.c.bf16 %v1406_v62, %v1404_v9  ;;  %v1588_v60 = vadd.f32 %v3242_v46, %v1587_v3  ;;  %v1356_v29 = vand.u32 2147483648, %v3523_v63  ;;  %vm3562_vm10 = vmor %vm1335_vm6, %vm1336_vm7 }
 0x2c8   :  { %v1332_v15 = vsub.f32 1.0, %v1331_v5  ;;  %v1641_v7 = vpop.f32.mrf.mxu3  ;;  %v1371_v21 = vand.u32 2147483648, %v3526_v35  ;;  %v1369_v34 = vand.u32 2147483647, %v3526_v35  ;;  %v1342_v40 = vor.u32 1.1754944e-38, %v1341_v31 }
 0x2c9   :  { %v1318_v0 = vmul.f32 %v2044_v10, %v1317_v48  ;;  %1658 = vmatmul.bf16.gmra.mxu3 %v1426_v6  ;;  %v2048_v61 = vpop.eup %2047  ;;  %v1642_v44 = vadd.f32 %v1641_v7, %v1588_v60  ;;  %vm1350_vm14 = vweird.f32 %v3523_v63  ;;  %v1357_v26 = vor.u32 1.1754944e-38, %v1356_v29 }
 0x2ca   :  { %v1333_v55 = vmul.f32 %v2046_v33, %v1332_v15  ;;  %v2050_v39 = vpop.eup %2049  ;;  %v1346_v16 = vmul.f32 %v2048_v61, %v3523_v63  ;;  %vm1351_vm11 = vweird.f32 %v2048_v61  ;;  %vm1365_vm1 = vweird.f32 %v3526_v35 }
 0x2cb   :  { %v1319_v58 = vadd.f32 %v2044_v10, %v1318_v0  ;;  %v1361_v47 = vmul.f32 %v2050_v39, %v3526_v35  ;;  %1676 = vst.msk [vmem:[%s3636_s7 + $0x38] sm:$0xff] %vm47_vm0, %v1642_v44  ;;  %vm1366_vm12 = vweird.f32 %v2050_v39  ;;  %vm1352_vm15 = vmor %vm1350_vm14, %vm1351_vm11  ;;  %vm1355_vm2 = vcmp.eq.f32.partialorder %v1354_v8, 8.507059e+37 }
 0x2cc   :  { %v1334_v13 = vadd.f32 %v2046_v33, %v1333_v55  ;;  %v1347_v42 = vsub.f32 1.0, %v1346_v16  ;;  %vm1367_vm3 = vmor %vm1365_vm1, %vm1366_vm12  ;;  %v1372_v2 = vor.u32 1.1754944e-38, %v1371_v21  ;;  %vm1370_vm4 = vcmp.eq.f32.partialorder %v1369_v34, 8.507059e+37 }
 0x2cd   :  { %v1362_v57 = vsub.f32 1.0, %v1361_v47  ;;  %v1323_v53 = vsel %vm3554_vm9, %v2044_v10, %v1319_v58 }
 0x2ce   :  { %v1348_v49 = vmul.f32 %v2048_v61, %v1347_v42  ;;  %v1338_v18 = vsel %vm3562_vm10, %v2046_v33, %v1334_v13  ;;  %v1328_v27 = vsel %vm3548_vm8, %v1327_v30, %v1323_v53 }
 0x2cf   :  { %v1363_v38 = vmul.f32 %v2050_v39, %v1362_v57  ;;  %v1590_v25 = vpop.f32.mrf.mxu2  ;;  %v1343_v12 = vsel %vm1340_vm13, %v1342_v40, %v1338_v18  ;;  %v1407_v52 = vmul.f32 %v1328_v27, %v3450_v28 }
 0x2d0   :  { %v1349_v11 = vadd.f32 %v2048_v61, %v1348_v49  ;;  %v1591_v23 = vadd.f32 %v3242_v46, %v1590_v25  ;;  %v1408_v50 = vmul.f32 %v1343_v12, %v3453_v51 }
 0x2d1   :  { %v1364_v43 = vadd.f32 %v2050_v39, %v1363_v38 }
 0x2d2   :  { %v1353_v37 = vsel %vm1352_vm15, %v2048_v61, %v1349_v11 }
 0x2d3   :  { %v1358_v19 = vsel %vm1355_vm2, %v1357_v26, %v1353_v37  ;;  %v1368_v17 = vsel %vm1367_vm3, %v2050_v39, %v1364_v43 }
 0x2d4   :  { %v1409_v14 = vmul.f32 %v1358_v19, %v3473_v1  ;;  %v1373_v41 = vsel %vm1370_vm4, %v1372_v2, %v1368_v17  ;;  %v1644_v62 = vpop.f32.mrf.mxu3 }
 0x2d5   :  { %v1410_v63 = vmul.f32 %v1373_v41, %v3479_v36  ;;  %v1645_v20 = vadd.f32 %v1644_v62, %v1591_v23 }
 0x2d6   :  { %v1427_v35 = vpack.c.bf16 %v1409_v14, %v1407_v52 }
 0x2d7   :  { %v1428_v24 = vpack.c.bf16 %v1410_v63, %v1408_v50  ;;  %v1592_v10 = vpop.f32.mrf.mxu2  ;;  %1677 = vst.msk [vmem:[%s3636_s7 + $0x40] sm:$0xff] %vm47_vm0, %v1645_v20 }
 0x2d8   :  { %1609 = vmatmul.bf16.gmra.mxu2 %v1427_v35  ;;  %v1593_v28 = vadd.f32 %v3242_v46, %v1592_v10 }
 0x2d9   :  { %1663 = vmatmul.bf16.gmra.mxu3 %v1428_v24 }
 0x2dc   :  { %v1646_v1 = vpop.f32.mrf.mxu3 }
 0x2dd   :  { %v1647_v33 = vadd.f32 %v1646_v1, %v1593_v28 }
 0x2df   :  { %1678 = vst.msk [vmem:[%s3636_s7 + $0x48] sm:$0xff] %vm47_vm0, %v1647_v33 }
 0x2e1   :  { %v1595_v51 = vpop.f32.mrf.mxu2 }
 0x2e2   :  { %v1596_v36 = vadd.f32 %v3242_v46, %v1595_v51 }
 0x2e4   :  { %v1649_v9 = vpop.f32.mrf.mxu3 }
 0x2e5   :  { %v1650_v4 = vadd.f32 %v1649_v9, %v1596_v36 }
 0x2e7   :  { %1679 = vst.msk [vmem:[%s3636_s7 + $0x50] sm:$0xff] %vm47_vm0, %v1650_v4 }
 0x2e9   :  { %v1597_v5 = vpop.f32.mrf.mxu2 }
 0x2ea   :  { %v1598_v48 = vadd.f32 %v3242_v46, %v1597_v5 }
 0x2ec   :  { %v1651_v3 = vpop.f32.mrf.mxu3 }
 0x2ed   :  { %v1652_v6 = vadd.f32 %v1651_v3, %v1598_v48 }
 0x2ef   :  { %1680 = vst.msk [vmem:[%s3636_s7 + $0x58] sm:$0xff] %vm47_vm0, %v1652_v6 }
 0x2f9   :  { %v1600_v15 = vpop.f32.mrf.mxu2 }
 0x2fa   :  { %v1601_v60 = vadd.f32 %v3242_v46, %v1600_v15 }
 0x2fc   :  { %v1654_v0 = vpop.f32.mrf.mxu3 }
 0x2fd   :  { %v1655_v32 = vadd.f32 %v1654_v0, %v1601_v60 }
 0x2ff   :  { %1681 = vst.msk [vmem:[%s3636_s7 + $0x60] sm:$0xff] %vm47_vm0, %v1655_v32 }
 0x301   :  { %v1602_v7 = vpop.f32.mrf.mxu2 }
 0x302   :  { %v1603_v61 = vadd.f32 %v3242_v46, %v1602_v7 }
 0x304   :  { %v1656_v54 = vpop.f32.mrf.mxu3 }
 0x305   :  { %v1657_v55 = vadd.f32 %v1656_v54, %v1603_v61 }
 0x307   :  { %1682 = vst.msk [vmem:[%s3636_s7 + $0x68] sm:$0xff] %vm47_vm0, %v1657_v55 }
 0x349   :  { %v1605_v44 = vpop.f32.mrf.mxu2 }
 0x34a   :  { %v1606_v39 = vadd.f32 %v3242_v46, %v1605_v44 }
 0x34c   :  { %v1659_v58 = vpop.f32.mrf.mxu3 }
 0x34d   :  { %v1660_v16 = vadd.f32 %v1659_v58, %v1606_v39 }
 0x34f   :  { %1683 = vst.msk [vmem:[%s3636_s7 + $0x70] sm:$0xff] %vm47_vm0, %v1660_v16 }
 0x351   :  { %v1607_v13 = vpop.f32.mrf.mxu2 }
 0x352   :  { %v1608_v47 = vadd.f32 %v3242_v46, %v1607_v13 }
 0x354   :  { %v1661_v59 = vpop.f32.mrf.mxu3 }
 0x355   :  { %v1662_v22 = vadd.f32 %v1661_v59, %v1608_v47 }
 0x357   :  { %1684 = vst.msk [vmem:[%s3636_s7 + $0x78] sm:$0xff] %vm47_vm0, %v1662_v22 }
 0x35b   :  { %v1610_v31 = vpop.f32.mrf.mxu2 }
 0x35c   :  { %v1611_v42 = vadd.f32 %v3242_v46, %v1610_v31  ;;  %v1664_v56 = vpop.f32.mrf.mxu3 }
 0x35e   :  { %v1665_v30 = vadd.f32 %v1664_v56, %v1611_v42 }
 0x360   :  { %1685 = vst.msk [vmem:[%s3636_s7 + $0x80] sm:$0xff] %vm47_vm0, %v1665_v30 }
 0x363   :  { %v1612_v8 = vpop.f32.mrf.mxu2 }
 0x364   :  { %v1613_v29 = vadd.f32 %v3242_v46, %v1612_v8  ;;  %v1666_v57 = vpop.f32.mrf.mxu3 }
 0x366   :  { %v1667_v53 = vadd.f32 %v1666_v57, %v1613_v29 }
 0x368   :  { %1686 = vst.msk [vmem:[%s3636_s7 + $0x88] sm:$0xff] %vm47_vm0, %v1667_v53 }

</bundles_post_ra>
